<compile_context>
chip_gen: v6e
topology: v6e:2x2x1
jax: 0.10.0
libtpu: 0.0.40
codegen_flags: <defaults>
</compile_context>

<pallas_src>
import functools

import jax
import jax.numpy as jnp
from jax.experimental import pallas as pl
from jax.experimental.pallas import tpu as pltpu

ACT_DTYPE = jnp.float32     # residual stream / LN / softmax math
MM_DTYPE = jnp.bfloat16     # MXU operands (weights stored in bf16)
EPS = 1e-5                  # torch.nn.LayerNorm default
NEG_INF = -1e30             # finite large-negative mask (avoids inf-inf NaN)


def _ln(x, g, b):
    mu = jnp.mean(x, axis=-1, keepdims=True)
    var = jnp.mean((x - mu) ** 2, axis=-1, keepdims=True)
    return (x - mu) * jax.lax.rsqrt(var + EPS) * g + b


# ----------------------------- kernels ---------------------------------------


def stack_kernel(x_ref, pos_ref,
                 ln1_g, ln1_b, wqkv, bqkv, wo, bo,
                 ln2_g, ln2_b, wfc, bfc, wpr, bpr,
                 out_ref, *, n_heads):
    layer = pl.program_id(1)

    # Layer 0: initialize the VMEM-resident residual stream with x + pos.
    @pl.when(layer == 0)
    def _():
        out_ref[...] = (x_ref[...].astype(ACT_DTYPE)
                        + pos_ref[...][None, :, :].astype(ACT_DTYPE))

    B, L, D = out_ref.shape
    N = B * L
    hd = D // n_heads
    scale = float(hd) ** -0.5

    x = out_ref[...].reshape(N, D).astype(jnp.float32)

    # Causal mask built in-kernel: 0 on/below the diagonal, NEG_INF above.
    row = jax.lax.broadcasted_iota(jnp.int32, (L, L), 0)
    col = jax.lax.broadcasted_iota(jnp.int32, (L, L), 1)
    mask = jnp.where(col > row, jnp.float32(NEG_INF), jnp.float32(0.0))

    # ---- multi-head causal self-attention branch ----
    h = _ln(x, ln1_g[0], ln1_b[0])
    qkv = jnp.dot(h.astype(MM_DTYPE), wqkv[0],
                  preferred_element_type=jnp.float32) + bqkv[0]     # (N, 3D) f32

    # NOTE: heads stay a static python loop (matmuls are still batched over B
    # per head); making (B*H) a leading batch dim would require a major-dim
    # transpose of the activations that Mosaic relayouts expensively.
    head_outs = []
    for hi in range(n_heads):
        q0 = hi * hd
        qh = qkv[:, q0:q0 + hd].reshape(B, L, hd).astype(MM_DTYPE)
        kh = qkv[:, D + q0:D + q0 + hd].reshape(B, L, hd).astype(MM_DTYPE)
        vh = qkv[:, 2 * D + q0:2 * D + q0 + hd].reshape(B, L, hd).astype(MM_DTYPE)
        s = jnp.einsum('bqe,bke->bqk', qh, kh,
                       preferred_element_type=jnp.float32) * scale
        s = s + mask[None, :, :]
        s = s - jnp.max(s, axis=-1, keepdims=True)
        p = jnp.exp(s)
        p = p * pl.reciprocal(jnp.sum(p, axis=-1, keepdims=True), approx=True)
        head_outs.append(jnp.einsum('bqk,bke->bqe', p.astype(MM_DTYPE), vh,
                                    preferred_element_type=jnp.float32))
    attn = jnp.concatenate(head_outs, axis=-1).reshape(N, D)
    attn = jnp.dot(attn.astype(MM_DTYPE), wo[0],
                   preferred_element_type=jnp.float32) + bo[0]
    x = x + attn

    # ---- MLP branch (QuickGELU, as in OpenAI CLIP) ----
    h2 = _ln(x, ln2_g[0], ln2_b[0])
    m = jnp.dot(h2.astype(MM_DTYPE), wfc[0],
                preferred_element_type=jnp.float32) + bfc[0]
    m = m * jax.nn.sigmoid(1.702 * m)
    m = jnp.dot(m.astype(MM_DTYPE), wpr[0],
                preferred_element_type=jnp.float32) + bpr[0]
    x = x + m

    out_ref[...] = x.reshape(B, L, D).astype(out_ref.dtype)


def eot_ln_proj_kernel(x_ref, onehot_ref, g_ref, b_ref, proj_ref, out_ref):
    # EOT-row selection happens BEFORE ln_final (LN is per-token => exact),
    # so LN + projection run on B rows instead of B*L.
    x = x_ref[...].astype(jnp.float32)                    # (B, L, D)
    oh = onehot_ref[...].astype(jnp.float32)              # (B, L)
    feat = jnp.sum(oh[:, :, None] * x, axis=1)            # (B, D)
    feat = _ln(feat, g_ref[...], b_ref[...])              # ln_final
    out_ref[...] = jnp.dot(feat.astype(MM_DTYPE), proj_ref[...],
                           preferred_element_type=jnp.float32).astype(out_ref.dtype)


# ----------------------------- wrappers ---------------------------------------


def transformer_stack(x, pos, stack, n_heads, *, batch_tiles=1):
    """Runs (x + pos) through all residual attention blocks in one pallas_call."""
    n_layers = stack["wqkv"].shape[0]
    B, L, D = x.shape
    assert B % batch_tiles == 0
    bt = B // batch_tiles

    order = ("ln1_g", "ln1_b", "wqkv", "bqkv", "wo", "bo",
             "ln2_g", "ln2_b", "wfc", "bfc", "wproj", "bproj")
    weights = [stack[k] for k in order]

    def layer_spec(arr):
        # one layer's slice of the stacked parameter, pipelined along the layer axis
        return pl.BlockSpec((1,) + arr.shape[1:], lambda b, l: (l, 0, 0))

    in_specs = ([pl.BlockSpec((bt, L, D), lambda b, l: (b, 0, 0)),
                 pl.BlockSpec((L, D), lambda b, l: (0, 0))]
                + [layer_spec(w) for w in weights])

    kernel = functools.partial(stack_kernel, n_heads=n_heads)
    return pl.pallas_call(
        kernel,
        out_shape=jax.ShapeDtypeStruct((B, L, D), ACT_DTYPE),
        grid=(batch_tiles, n_layers),
        in_specs=in_specs,
        out_specs=pl.BlockSpec((bt, L, D), lambda b, l: (b, 0, 0)),
        compiler_params=pltpu.CompilerParams(
            dimension_semantics=("parallel", "arbitrary")),
    )(x, pos, *weights)


def eot_ln_project(x, onehot, g, b, proj):
    B = x.shape[0]
    E = proj.shape[1]
    return pl.pallas_call(
        eot_ln_proj_kernel,
        out_shape=jax.ShapeDtypeStruct((B, E), jnp.float32),
        in_specs=[pl.BlockSpec(memory_space=pltpu.MemorySpace.VMEM)
                  for _ in range(5)],
        out_specs=pl.BlockSpec(memory_space=pltpu.MemorySpace.VMEM),
    )(x, onehot, g, b, proj)


def text_encoder_forward(params, prompts, class_feature, weight,
                         tokenized_prompts, flag=False):
    if not flag:
        # TODO(synk): TCP's class-aware transformer.resblocks([x, class_feature,
        # weight, counter]) is not defined in the provided module; running the
        # standard CLIP resblock stack (class_feature / weight unused).
        pass
    # x = prompts + positional_embedding  (fused into layer 0 of the stack);
    # permute(1,0,2) pairs are layout-only and absorbed by (B, L, D) kernels.
    x = transformer_stack(prompts.astype(ACT_DTYPE), params["pos"],
                          params["stack"], params["n_heads"])
    L = x.shape[1]
    eot = jnp.argmax(tokenized_prompts, axis=-1)              # (B,)
    onehot = jax.nn.one_hot(eot, L, dtype=jnp.float32)
    return eot_ln_project(x, onehot, params["lnf_g"], params["lnf_b"],
                          params["text_projection"])


# ----------------------------- deterministic init -----------------------------


def init_params(key, L, D, n_heads, n_layers, embed_dim):
    ks = jax.random.split(key, 6)
    return {
        "n_heads": n_heads,
        "pos": 0.01 * jax.random.normal(ks[0], (L, D), jnp.float32),
        "lnf_g": jnp.ones((1, D), jnp.float32),
        "lnf_b": jnp.zeros((1, D), jnp.float32),
        "text_projection": ((D ** -0.5) * jax.random.normal(
            ks[1], (D, embed_dim), jnp.float32)).astype(MM_DTYPE),
        "stack": {
            # per-layer params stacked along a leading layer axis
            "ln1_g": jnp.ones((n_layers, 1, D), jnp.float32),
            "ln1_b": jnp.zeros((n_layers, 1, D), jnp.float32),
            "wqkv": (0.02 * jax.random.normal(
                ks[2], (n_layers, D, 3 * D), jnp.float32)).astype(MM_DTYPE),
            "bqkv": jnp.zeros((n_layers, 1, 3 * D), jnp.float32),
            "wo": (0.02 * jax.random.normal(
                ks[3], (n_layers, D, D), jnp.float32)).astype(MM_DTYPE),
            "bo": jnp.zeros((n_layers, 1, D), jnp.float32),
            "ln2_g": jnp.ones((n_layers, 1, D), jnp.float32),
            "ln2_b": jnp.zeros((n_layers, 1, D), jnp.float32),
            "wfc": (0.02 * jax.random.normal(
                ks[4], (n_layers, D, 4 * D), jnp.float32)).astype(MM_DTYPE),
            "bfc": jnp.zeros((n_layers, 1, 4 * D), jnp.float32),
            "wproj": (0.02 * jax.random.normal(
                ks[5], (n_layers, 4 * D, D), jnp.float32)).astype(MM_DTYPE),
            "bproj": jnp.zeros((n_layers, 1, D), jnp.float32),
        },
    }


if __name__ == "__main__":
    B, L, D, HEADS, LAYERS, EMBED = 2, 8, 32, 4, 2, 16

    key = jax.random.PRNGKey(0)
    k_p, k_cf, k_w, k_params = jax.random.split(key, 4)

    params = init_params(k_params, L, D, HEADS, LAYERS, EMBED)

    prompts = jax.random.normal(k_p, (B, L, D), jnp.float32)       # learned + token embeds
    class_feature = jax.random.normal(k_cf, (B, EMBED), jnp.float32)  # unused (see TODO)
    weight = jax.random.normal(k_w, (EMBED, D), jnp.float32)          # unused (see TODO)

    # tokenized prompts: EOT token is the arg-max value along the sequence
    tokenized_prompts = jnp.array(
        [[49406, 320, 1125, 539, 2368, 49407, 0, 0],
         [49406, 320, 1125, 539, 1929, 2368, 49407, 0]], dtype=jnp.int32)

    out = text_encoder_forward(params, prompts, class_feature, weight,
                               tokenized_prompts, flag=False)
    out = jax.block_until_ready(out)
    assert out.shape == (B, EMBED) and jnp.all(jnp.isfinite(out))
    print("KERNEL_OK")
</pallas_src>

<mosaic_0001>
module attributes {stable_mosaic.version = 11 : i64} {
  func.func @stack_kernel(%arg0: i32, %arg1: i32, %arg2: memref<2x8x32xf32, #tpu.memory_space<vmem>>, %arg3: memref<8x32xf32, #tpu.memory_space<vmem>>, %arg4: memref<1x1x32xf32, #tpu.memory_space<vmem>>, %arg5: memref<1x1x32xf32, #tpu.memory_space<vmem>>, %arg6: memref<1x32x96xbf16, #tpu.memory_space<vmem>>, %arg7: memref<1x1x96xf32, #tpu.memory_space<vmem>>, %arg8: memref<1x32x32xbf16, #tpu.memory_space<vmem>>, %arg9: memref<1x1x32xf32, #tpu.memory_space<vmem>>, %arg10: memref<1x1x32xf32, #tpu.memory_space<vmem>>, %arg11: memref<1x1x32xf32, #tpu.memory_space<vmem>>, %arg12: memref<1x32x128xbf16, #tpu.memory_space<vmem>>, %arg13: memref<1x1x128xf32, #tpu.memory_space<vmem>>, %arg14: memref<1x128x32xbf16, #tpu.memory_space<vmem>>, %arg15: memref<1x1x32xf32, #tpu.memory_space<vmem>>, %arg16: memref<2x8x32xf32, #tpu.memory_space<vmem>>) attributes {dimension_semantics = [#tpu.dimension_semantics<parallel>, #tpu.dimension_semantics<arbitrary>], iteration_bounds = array<i64: 1, 2>, scalar_prefetch = 0 : i64, scratch_operands = 0 : i64, tpu.core_type = #tpu.core_type<tc>, window_params = [{transform_indices = @transform_0, window_bounds = array<i64: 2, 8, 32>}, {pipeline_mode = #tpu.pipeline_mode<synchronous>, transform_indices = @transform_1, window_bounds = array<i64: 8, 32>}, {transform_indices = @transform_2, window_bounds = array<i64: 1, 1, 32>}, {transform_indices = @transform_3, window_bounds = array<i64: 1, 1, 32>}, {transform_indices = @transform_4, window_bounds = array<i64: 1, 32, 96>}, {transform_indices = @transform_5, window_bounds = array<i64: 1, 1, 96>}, {transform_indices = @transform_6, window_bounds = array<i64: 1, 32, 32>}, {transform_indices = @transform_7, window_bounds = array<i64: 1, 1, 32>}, {transform_indices = @transform_8, window_bounds = array<i64: 1, 1, 32>}, {transform_indices = @transform_9, window_bounds = array<i64: 1, 1, 32>}, {transform_indices = @transform_10, window_bounds = array<i64: 1, 32, 128>}, {transform_indices = @transform_11, window_bounds = array<i64: 1, 1, 128>}, {transform_indices = @transform_12, window_bounds = array<i64: 1, 128, 32>}, {transform_indices = @transform_13, window_bounds = array<i64: 1, 1, 32>}, {transform_indices = @transform_14, window_bounds = array<i64: 2, 8, 32>}]} {
    %c0_i32 = arith.constant 0 : i32
    %0 = arith.cmpi eq, %arg1, %c0_i32 : i32
    %1 = arith.extui %0 : i1 to i32
    %c0_i32_0 = arith.constant 0 : i32
    %2 = arith.cmpi ne, %1, %c0_i32_0 : i32
    scf.if %2 {
      %c0_79 = arith.constant 0 : index
      %c0_80 = arith.constant 0 : index
      %c0_81 = arith.constant 0 : index
      %217 = vector.load %arg2[%c0_79, %c0_80, %c0_81] : memref<2x8x32xf32, #tpu.memory_space<vmem>>, vector<2x8x32xf32>
      %c0_82 = arith.constant 0 : index
      %c0_83 = arith.constant 0 : index
      %218 = vector.load %arg3[%c0_82, %c0_83] : memref<8x32xf32, #tpu.memory_space<vmem>>, vector<8x32xf32>
      %219 = vector.shape_cast %218 : vector<8x32xf32> to vector<1x8x32xf32>
      %220 = vector.broadcast %219 : vector<1x8x32xf32> to vector<2x8x32xf32>
      %221 = arith.addf %217, %220 : vector<2x8x32xf32>
      %c0_84 = arith.constant 0 : index
      %c0_85 = arith.constant 0 : index
      %c0_86 = arith.constant 0 : index
      %222 = vector.load %arg16[%c0_84, %c0_85, %c0_86] : memref<2x8x32xf32, #tpu.memory_space<vmem>>, vector<2x8x32xf32>
      tpu.vector_store %arg16[%c0_84, %c0_85, %c0_86], %221 {strides = array<i32>} : memref<2x8x32xf32, #tpu.memory_space<vmem>>, vector<2x8x32xf32>,
    } else {
    }
    %c0 = arith.constant 0 : index
    %c0_1 = arith.constant 0 : index
    %c0_2 = arith.constant 0 : index
    %3 = vector.load %arg16[%c0, %c0_1, %c0_2] : memref<2x8x32xf32, #tpu.memory_space<vmem>>, vector<2x8x32xf32>
    %4 = vector.shape_cast %3 : vector<2x8x32xf32> to vector<16x32xf32>
    %5 = tpu.iota {dimensions = array<i32: 0>} : vector<8x8xi32>
    %6 = tpu.iota {dimensions = array<i32: 1>} : vector<8x8xi32>
    %7 = arith.cmpi sgt, %6, %5 : vector<8x8xi32>
    %cst = arith.constant -1.000000e+30 : f32
    %cst_3 = arith.constant 0.000000e+00 : f32
    %8 = vector.broadcast %cst : f32 to vector<8x8xf32>
    %9 = vector.broadcast %cst_3 : f32 to vector<8x8xf32>
    %10 = arith.select %7, %8, %9 : vector<8x8xi1>, vector<8x8xf32>
    %c0_4 = arith.constant 0 : index
    %c0_5 = arith.constant 0 : index
    %c0_6 = arith.constant 0 : index
    %11 = vector.load %arg4[%c0_4, %c0_5, %c0_6] : memref<1x1x32xf32, #tpu.memory_space<vmem>>, vector<1x1x32xf32>
    %12 = vector.shape_cast %11 : vector<1x1x32xf32> to vector<1x32xf32>
    %c0_7 = arith.constant 0 : index
    %c0_8 = arith.constant 0 : index
    %c0_9 = arith.constant 0 : index
    %13 = vector.load %arg5[%c0_7, %c0_8, %c0_9] : memref<1x1x32xf32, #tpu.memory_space<vmem>>, vector<1x1x32xf32>
    %14 = vector.shape_cast %13 : vector<1x1x32xf32> to vector<1x32xf32>
    %cst_10 = arith.constant dense<0.000000e+00> : vector<16xf32>
    %15 = vector.multi_reduction <add>, %4, %cst_10 [1] : vector<16x32xf32> to vector<16xf32>
    %16 = vector.shape_cast %15 : vector<16xf32> to vector<16x1xf32>
    %cst_11 = arith.constant 3.200000e+01 : f32
    %17 = vector.broadcast %cst_11 : f32 to vector<16x1xf32>
    %18 = arith.divf %16, %17 : vector<16x1xf32>
    %19 = vector.broadcast %18 : vector<16x1xf32> to vector<16x32xf32>
    %20 = arith.subf %4, %19 : vector<16x32xf32>
    %21 = arith.mulf %20, %20 : vector<16x32xf32>
    %cst_12 = arith.constant dense<0.000000e+00> : vector<16xf32>
    %22 = vector.multi_reduction <add>, %21, %cst_12 [1] : vector<16x32xf32> to vector<16xf32>
    %23 = vector.shape_cast %22 : vector<16xf32> to vector<16x1xf32>
    %cst_13 = arith.constant 3.200000e+01 : f32
    %24 = vector.broadcast %cst_13 : f32 to vector<16x1xf32>
    %25 = arith.divf %23, %24 : vector<16x1xf32>
    %26 = vector.broadcast %18 : vector<16x1xf32> to vector<16x32xf32>
    %27 = arith.subf %4, %26 : vector<16x32xf32>
    %cst_14 = arith.constant 9.99999974E-6 : f32
    %28 = vector.broadcast %cst_14 : f32 to vector<16x1xf32>
    %29 = arith.addf %25, %28 : vector<16x1xf32>
    %30 = math.rsqrt %29 : vector<16x1xf32>
    %31 = vector.broadcast %30 : vector<16x1xf32> to vector<16x32xf32>
    %32 = arith.mulf %27, %31 : vector<16x32xf32>
    %33 = vector.broadcast %12 : vector<1x32xf32> to vector<16x32xf32>
    %34 = arith.mulf %32, %33 : vector<16x32xf32>
    %35 = vector.broadcast %14 : vector<1x32xf32> to vector<16x32xf32>
    %36 = arith.addf %34, %35 : vector<16x32xf32>
    %37 = arith.truncf %36 : vector<16x32xf32> to vector<16x32xbf16>
    %c0_15 = arith.constant 0 : index
    %c0_16 = arith.constant 0 : index
    %c0_17 = arith.constant 0 : index
    %38 = vector.load %arg6[%c0_15, %c0_16, %c0_17] : memref<1x32x96xbf16, #tpu.memory_space<vmem>>, vector<1x32x96xbf16>
    %39 = vector.shape_cast %38 : vector<1x32x96xbf16> to vector<32x96xbf16>
    %cst_18 = arith.constant dense<0.000000e+00> : vector<16x96xf32>
    %40 = tpu.matmul %37, %39, %cst_18 {dimension_numbers = #tpu.dot_dimension_numbers<[1], [0], [0], [1], [0, 0, 1, 1], [], []>} : vector<16x32xbf16>, vector<32x96xbf16>, vector<16x96xf32> -> vector<16x96xf32>
    %c0_19 = arith.constant 0 : index
    %c0_20 = arith.constant 0 : index
    %c0_21 = arith.constant 0 : index
    %41 = vector.load %arg7[%c0_19, %c0_20, %c0_21] : memref<1x1x96xf32, #tpu.memory_space<vmem>>, vector<1x1x96xf32>
    %42 = vector.shape_cast %41 : vector<1x1x96xf32> to vector<1x96xf32>
    %43 = vector.broadcast %42 : vector<1x96xf32> to vector<16x96xf32>
    %44 = arith.addf %40, %43 : vector<16x96xf32>
    %45 = vector.extract_strided_slice %44 {offsets = [0, 0], sizes = [16, 8], strides = [1, 1]} : vector<16x96xf32> to vector<16x8xf32>
    %46 = vector.shape_cast %45 : vector<16x8xf32> to vector<2x8x8xf32>
    %47 = arith.truncf %46 : vector<2x8x8xf32> to vector<2x8x8xbf16>
    %48 = vector.extract_strided_slice %44 {offsets = [0, 32], sizes = [16, 8], strides = [1, 1]} : vector<16x96xf32> to vector<16x8xf32>
    %49 = vector.shape_cast %48 : vector<16x8xf32> to vector<2x8x8xf32>
    %50 = arith.truncf %49 : vector<2x8x8xf32> to vector<2x8x8xbf16>
    %51 = vector.extract_strided_slice %44 {offsets = [0, 64], sizes = [16, 8], strides = [1, 1]} : vector<16x96xf32> to vector<16x8xf32>
    %52 = vector.shape_cast %51 : vector<16x8xf32> to vector<2x8x8xf32>
    %53 = arith.truncf %52 : vector<2x8x8xf32> to vector<2x8x8xbf16>
    "tpu.trace_start"() <{level = 10 : i32, message = "bqe,bke->bqk"}> : () -> ()
    %cst_22 = arith.constant dense<0.000000e+00> : vector<2x8x8xf32>
    %54 = tpu.matmul %47, %50, %cst_22 {dimension_numbers = #tpu.dot_dimension_numbers<[2], [2], [1], [1], [0, 0, 0, 1, 1, 1], [0], [0]>} : vector<2x8x8xbf16>, vector<2x8x8xbf16>, vector<2x8x8xf32> -> vector<2x8x8xf32>
    "tpu.trace_stop"() : () -> ()
    %cst_23 = arith.constant 0.353553385 : f32
    %55 = vector.broadcast %cst_23 : f32 to vector<2x8x8xf32>
    %56 = arith.mulf %54, %55 : vector<2x8x8xf32>
    %57 = vector.shape_cast %10 : vector<8x8xf32> to vector<1x8x8xf32>
    %58 = vector.broadcast %57 : vector<1x8x8xf32> to vector<2x8x8xf32>
    %59 = arith.addf %56, %58 : vector<2x8x8xf32>
    %cst_24 = arith.constant dense<0xFF800000> : vector<2x8xf32>
    %60 = vector.multi_reduction <maximumf>, %59, %cst_24 [2] : vector<2x8x8xf32> to vector<2x8xf32>
    %61 = vector.shape_cast %60 : vector<2x8xf32> to vector<2x8x1xf32>
    %62 = vector.broadcast %61 : vector<2x8x1xf32> to vector<2x8x8xf32>
    %63 = arith.subf %59, %62 : vector<2x8x8xf32>
    %64 = math.exp %63 : vector<2x8x8xf32>
    %cst_25 = arith.constant dense<0.000000e+00> : vector<2x8xf32>
    %65 = vector.multi_reduction <add>, %64, %cst_25 [2] : vector<2x8x8xf32> to vector<2x8xf32>
    %66 = vector.shape_cast %65 : vector<2x8xf32> to vector<2x8x1xf32>
    %67 = tpu.reciprocal %66 {approx = true} : vector<2x8x1xf32> -> vector<2x8x1xf32>
    %68 = vector.broadcast %67 : vector<2x8x1xf32> to vector<2x8x8xf32>
    %69 = arith.mulf %64, %68 : vector<2x8x8xf32>
    %70 = arith.truncf %69 : vector<2x8x8xf32> to vector<2x8x8xbf16>
    "tpu.trace_start"() <{level = 10 : i32, message = "bqk,bke->bqe"}> : () -> ()
    %cst_26 = arith.constant dense<0.000000e+00> : vector<2x8x8xf32>
    %71 = tpu.matmul %70, %53, %cst_26 {dimension_numbers = #tpu.dot_dimension_numbers<[2], [1], [1], [2], [0, 0, 0, 1, 1, 2], [0], [0]>} : vector<2x8x8xbf16>, vector<2x8x8xbf16>, vector<2x8x8xf32> -> vector<2x8x8xf32>
    "tpu.trace_stop"() : () -> ()
    %72 = vector.extract_strided_slice %44 {offsets = [0, 8], sizes = [16, 8], strides = [1, 1]} : vector<16x96xf32> to vector<16x8xf32>
    %73 = vector.shape_cast %72 : vector<16x8xf32> to vector<2x8x8xf32>
    %74 = arith.truncf %73 : vector<2x8x8xf32> to vector<2x8x8xbf16>
    %75 = vector.extract_strided_slice %44 {offsets = [0, 40], sizes = [16, 8], strides = [1, 1]} : vector<16x96xf32> to vector<16x8xf32>
    %76 = vector.shape_cast %75 : vector<16x8xf32> to vector<2x8x8xf32>
    %77 = arith.truncf %76 : vector<2x8x8xf32> to vector<2x8x8xbf16>
    %78 = vector.extract_strided_slice %44 {offsets = [0, 72], sizes = [16, 8], strides = [1, 1]} : vector<16x96xf32> to vector<16x8xf32>
    %79 = vector.shape_cast %78 : vector<16x8xf32> to vector<2x8x8xf32>
    %80 = arith.truncf %79 : vector<2x8x8xf32> to vector<2x8x8xbf16>
    "tpu.trace_start"() <{level = 10 : i32, message = "bqe,bke->bqk"}> : () -> ()
    %cst_27 = arith.constant dense<0.000000e+00> : vector<2x8x8xf32>
    %81 = tpu.matmul %74, %77, %cst_27 {dimension_numbers = #tpu.dot_dimension_numbers<[2], [2], [1], [1], [0, 0, 0, 1, 1, 1], [0], [0]>} : vector<2x8x8xbf16>, vector<2x8x8xbf16>, vector<2x8x8xf32> -> vector<2x8x8xf32>
    "tpu.trace_stop"() : () -> ()
    %cst_28 = arith.constant 0.353553385 : f32
    %82 = vector.broadcast %cst_28 : f32 to vector<2x8x8xf32>
    %83 = arith.mulf %81, %82 : vector<2x8x8xf32>
    %84 = vector.shape_cast %10 : vector<8x8xf32> to vector<1x8x8xf32>
    %85 = vector.broadcast %84 : vector<1x8x8xf32> to vector<2x8x8xf32>
    %86 = arith.addf %83, %85 : vector<2x8x8xf32>
    %cst_29 = arith.constant dense<0xFF800000> : vector<2x8xf32>
    %87 = vector.multi_reduction <maximumf>, %86, %cst_29 [2] : vector<2x8x8xf32> to vector<2x8xf32>
    %88 = vector.shape_cast %87 : vector<2x8xf32> to vector<2x8x1xf32>
    %89 = vector.broadcast %88 : vector<2x8x1xf32> to vector<2x8x8xf32>
    %90 = arith.subf %86, %89 : vector<2x8x8xf32>
    %91 = math.exp %90 : vector<2x8x8xf32>
    %cst_30 = arith.constant dense<0.000000e+00> : vector<2x8xf32>
    %92 = vector.multi_reduction <add>, %91, %cst_30 [2] : vector<2x8x8xf32> to vector<2x8xf32>
    %93 = vector.shape_cast %92 : vector<2x8xf32> to vector<2x8x1xf32>
    %94 = tpu.reciprocal %93 {approx = true} : vector<2x8x1xf32> -> vector<2x8x1xf32>
    %95 = vector.broadcast %94 : vector<2x8x1xf32> to vector<2x8x8xf32>
    %96 = arith.mulf %91, %95 : vector<2x8x8xf32>
    %97 = arith.truncf %96 : vector<2x8x8xf32> to vector<2x8x8xbf16>
    "tpu.trace_start"() <{level = 10 : i32, message = "bqk,bke->bqe"}> : () -> ()
    %cst_31 = arith.constant dense<0.000000e+00> : vector<2x8x8xf32>
    %98 = tpu.matmul %97, %80, %cst_31 {dimension_numbers = #tpu.dot_dimension_numbers<[2], [1], [1], [2], [0, 0, 0, 1, 1, 2], [0], [0]>} : vector<2x8x8xbf16>, vector<2x8x8xbf16>, vector<2x8x8xf32> -> vector<2x8x8xf32>
    "tpu.trace_stop"() : () -> ()
    %99 = vector.extract_strided_slice %44 {offsets = [0, 16], sizes = [16, 8], strides = [1, 1]} : vector<16x96xf32> to vector<16x8xf32>
    %100 = vector.shape_cast %99 : vector<16x8xf32> to vector<2x8x8xf32>
    %101 = arith.truncf %100 : vector<2x8x8xf32> to vector<2x8x8xbf16>
    %102 = vector.extract_strided_slice %44 {offsets = [0, 48], sizes = [16, 8], strides = [1, 1]} : vector<16x96xf32> to vector<16x8xf32>
    %103 = vector.shape_cast %102 : vector<16x8xf32> to vector<2x8x8xf32>
    %104 = arith.truncf %103 : vector<2x8x8xf32> to vector<2x8x8xbf16>
    %105 = vector.extract_strided_slice %44 {offsets = [0, 80], sizes = [16, 8], strides = [1, 1]} : vector<16x96xf32> to vector<16x8xf32>
    %106 = vector.shape_cast %105 : vector<16x8xf32> to vector<2x8x8xf32>
    %107 = arith.truncf %106 : vector<2x8x8xf32> to vector<2x8x8xbf16>
    "tpu.trace_start"() <{level = 10 : i32, message = "bqe,bke->bqk"}> : () -> ()
    %cst_32 = arith.constant dense<0.000000e+00> : vector<2x8x8xf32>
    %108 = tpu.matmul %101, %104, %cst_32 {dimension_numbers = #tpu.dot_dimension_numbers<[2], [2], [1], [1], [0, 0, 0, 1, 1, 1], [0], [0]>} : vector<2x8x8xbf16>, vector<2x8x8xbf16>, vector<2x8x8xf32> -> vector<2x8x8xf32>
    "tpu.trace_stop"() : () -> ()
    %cst_33 = arith.constant 0.353553385 : f32
    %109 = vector.broadcast %cst_33 : f32 to vector<2x8x8xf32>
    %110 = arith.mulf %108, %109 : vector<2x8x8xf32>
    %111 = vector.shape_cast %10 : vector<8x8xf32> to vector<1x8x8xf32>
    %112 = vector.broadcast %111 : vector<1x8x8xf32> to vector<2x8x8xf32>
    %113 = arith.addf %110, %112 : vector<2x8x8xf32>
    %cst_34 = arith.constant dense<0xFF800000> : vector<2x8xf32>
    %114 = vector.multi_reduction <maximumf>, %113, %cst_34 [2] : vector<2x8x8xf32> to vector<2x8xf32>
    %115 = vector.shape_cast %114 : vector<2x8xf32> to vector<2x8x1xf32>
    %116 = vector.broadcast %115 : vector<2x8x1xf32> to vector<2x8x8xf32>
    %117 = arith.subf %113, %116 : vector<2x8x8xf32>
    %118 = math.exp %117 : vector<2x8x8xf32>
    %cst_35 = arith.constant dense<0.000000e+00> : vector<2x8xf32>
    %119 = vector.multi_reduction <add>, %118, %cst_35 [2] : vector<2x8x8xf32> to vector<2x8xf32>
    %120 = vector.shape_cast %119 : vector<2x8xf32> to vector<2x8x1xf32>
    %121 = tpu.reciprocal %120 {approx = true} : vector<2x8x1xf32> -> vector<2x8x1xf32>
    %122 = vector.broadcast %121 : vector<2x8x1xf32> to vector<2x8x8xf32>
    %123 = arith.mulf %118, %122 : vector<2x8x8xf32>
    %124 = arith.truncf %123 : vector<2x8x8xf32> to vector<2x8x8xbf16>
    "tpu.trace_start"() <{level = 10 : i32, message = "bqk,bke->bqe"}> : () -> ()
    %cst_36 = arith.constant dense<0.000000e+00> : vector<2x8x8xf32>
    %125 = tpu.matmul %124, %107, %cst_36 {dimension_numbers = #tpu.dot_dimension_numbers<[2], [1], [1], [2], [0, 0, 0, 1, 1, 2], [0], [0]>} : vector<2x8x8xbf16>, vector<2x8x8xbf16>, vector<2x8x8xf32> -> vector<2x8x8xf32>
    "tpu.trace_stop"() : () -> ()
    %126 = vector.extract_strided_slice %44 {offsets = [0, 24], sizes = [16, 8], strides = [1, 1]} : vector<16x96xf32> to vector<16x8xf32>
    %127 = vector.shape_cast %126 : vector<16x8xf32> to vector<2x8x8xf32>
    %128 = arith.truncf %127 : vector<2x8x8xf32> to vector<2x8x8xbf16>
    %129 = vector.extract_strided_slice %44 {offsets = [0, 56], sizes = [16, 8], strides = [1, 1]} : vector<16x96xf32> to vector<16x8xf32>
    %130 = vector.shape_cast %129 : vector<16x8xf32> to vector<2x8x8xf32>
    %131 = arith.truncf %130 : vector<2x8x8xf32> to vector<2x8x8xbf16>
    %132 = vector.extract_strided_slice %44 {offsets = [0, 88], sizes = [16, 8], strides = [1, 1]} : vector<16x96xf32> to vector<16x8xf32>
    %133 = vector.shape_cast %132 : vector<16x8xf32> to vector<2x8x8xf32>
    %134 = arith.truncf %133 : vector<2x8x8xf32> to vector<2x8x8xbf16>
    "tpu.trace_start"() <{level = 10 : i32, message = "bqe,bke->bqk"}> : () -> ()
    %cst_37 = arith.constant dense<0.000000e+00> : vector<2x8x8xf32>
    %135 = tpu.matmul %128, %131, %cst_37 {dimension_numbers = #tpu.dot_dimension_numbers<[2], [2], [1], [1], [0, 0, 0, 1, 1, 1], [0], [0]>} : vector<2x8x8xbf16>, vector<2x8x8xbf16>, vector<2x8x8xf32> -> vector<2x8x8xf32>
    "tpu.trace_stop"() : () -> ()
    %cst_38 = arith.constant 0.353553385 : f32
    %136 = vector.broadcast %cst_38 : f32 to vector<2x8x8xf32>
    %137 = arith.mulf %135, %136 : vector<2x8x8xf32>
    %138 = vector.shape_cast %10 : vector<8x8xf32> to vector<1x8x8xf32>
    %139 = vector.broadcast %138 : vector<1x8x8xf32> to vector<2x8x8xf32>
    %140 = arith.addf %137, %139 : vector<2x8x8xf32>
    %cst_39 = arith.constant dense<0xFF800000> : vector<2x8xf32>
    %141 = vector.multi_reduction <maximumf>, %140, %cst_39 [2] : vector<2x8x8xf32> to vector<2x8xf32>
    %142 = vector.shape_cast %141 : vector<2x8xf32> to vector<2x8x1xf32>
    %143 = vector.broadcast %142 : vector<2x8x1xf32> to vector<2x8x8xf32>
    %144 = arith.subf %140, %143 : vector<2x8x8xf32>
    %145 = math.exp %144 : vector<2x8x8xf32>
    %cst_40 = arith.constant dense<0.000000e+00> : vector<2x8xf32>
    %146 = vector.multi_reduction <add>, %145, %cst_40 [2] : vector<2x8x8xf32> to vector<2x8xf32>
    %147 = vector.shape_cast %146 : vector<2x8xf32> to vector<2x8x1xf32>
    %148 = tpu.reciprocal %147 {approx = true} : vector<2x8x1xf32> -> vector<2x8x1xf32>
    %149 = vector.broadcast %148 : vector<2x8x1xf32> to vector<2x8x8xf32>
    %150 = arith.mulf %145, %149 : vector<2x8x8xf32>
    %151 = arith.truncf %150 : vector<2x8x8xf32> to vector<2x8x8xbf16>
    "tpu.trace_start"() <{level = 10 : i32, message = "bqk,bke->bqe"}> : () -> ()
    %cst_41 = arith.constant dense<0.000000e+00> : vector<2x8x8xf32>
    %152 = tpu.matmul %151, %134, %cst_41 {dimension_numbers = #tpu.dot_dimension_numbers<[2], [1], [1], [2], [0, 0, 0, 1, 1, 2], [0], [0]>} : vector<2x8x8xbf16>, vector<2x8x8xbf16>, vector<2x8x8xf32> -> vector<2x8x8xf32>
    "tpu.trace_stop"() : () -> ()
    %153 = tpu.concatenate %71, %98, %125, %152 in 2 : vector<2x8x8xf32>, vector<2x8x8xf32>, vector<2x8x8xf32>, vector<2x8x8xf32> -> vector<2x8x32xf32>
    %154 = vector.shape_cast %153 : vector<2x8x32xf32> to vector<16x32xf32>
    %155 = arith.truncf %154 : vector<16x32xf32> to vector<16x32xbf16>
    %c0_42 = arith.constant 0 : index
    %c0_43 = arith.constant 0 : index
    %c0_44 = arith.constant 0 : index
    %156 = vector.load %arg8[%c0_42, %c0_43, %c0_44] : memref<1x32x32xbf16, #tpu.memory_space<vmem>>, vector<1x32x32xbf16>
    %157 = vector.shape_cast %156 : vector<1x32x32xbf16> to vector<32x32xbf16>
    %cst_45 = arith.constant dense<0.000000e+00> : vector<16x32xf32>
    %158 = tpu.matmul %155, %157, %cst_45 {dimension_numbers = #tpu.dot_dimension_numbers<[1], [0], [0], [1], [0, 0, 1, 1], [], []>} : vector<16x32xbf16>, vector<32x32xbf16>, vector<16x32xf32> -> vector<16x32xf32>
    %c0_46 = arith.constant 0 : index
    %c0_47 = arith.constant 0 : index
    %c0_48 = arith.constant 0 : index
    %159 = vector.load %arg9[%c0_46, %c0_47, %c0_48] : memref<1x1x32xf32, #tpu.memory_space<vmem>>, vector<1x1x32xf32>
    %160 = vector.shape_cast %159 : vector<1x1x32xf32> to vector<1x32xf32>
    %161 = vector.broadcast %160 : vector<1x32xf32> to vector<16x32xf32>
    %162 = arith.addf %158, %161 : vector<16x32xf32>
    %163 = arith.addf %4, %162 : vector<16x32xf32>
    %c0_49 = arith.constant 0 : index
    %c0_50 = arith.constant 0 : index
    %c0_51 = arith.constant 0 : index
    %164 = vector.load %arg10[%c0_49, %c0_50, %c0_51] : memref<1x1x32xf32, #tpu.memory_space<vmem>>, vector<1x1x32xf32>
    %165 = vector.shape_cast %164 : vector<1x1x32xf32> to vector<1x32xf32>
    %c0_52 = arith.constant 0 : index
    %c0_53 = arith.constant 0 : index
    %c0_54 = arith.constant 0 : index
    %166 = vector.load %arg11[%c0_52, %c0_53, %c0_54] : memref<1x1x32xf32, #tpu.memory_space<vmem>>, vector<1x1x32xf32>
    %167 = vector.shape_cast %166 : vector<1x1x32xf32> to vector<1x32xf32>
    %cst_55 = arith.constant dense<0.000000e+00> : vector<16xf32>
    %168 = vector.multi_reduction <add>, %163, %cst_55 [1] : vector<16x32xf32> to vector<16xf32>
    %169 = vector.shape_cast %168 : vector<16xf32> to vector<16x1xf32>
    %cst_56 = arith.constant 3.200000e+01 : f32
    %170 = vector.broadcast %cst_56 : f32 to vector<16x1xf32>
    %171 = arith.divf %169, %170 : vector<16x1xf32>
    %172 = vector.broadcast %171 : vector<16x1xf32> to vector<16x32xf32>
    %173 = arith.subf %163, %172 : vector<16x32xf32>
    %174 = arith.mulf %173, %173 : vector<16x32xf32>
    %cst_57 = arith.constant dense<0.000000e+00> : vector<16xf32>
    %175 = vector.multi_reduction <add>, %174, %cst_57 [1] : vector<16x32xf32> to vector<16xf32>
    %176 = vector.shape_cast %175 : vector<16xf32> to vector<16x1xf32>
    %cst_58 = arith.constant 3.200000e+01 : f32
    %177 = vector.broadcast %cst_58 : f32 to vector<16x1xf32>
    %178 = arith.divf %176, %177 : vector<16x1xf32>
    %179 = vector.broadcast %171 : vector<16x1xf32> to vector<16x32xf32>
    %180 = arith.subf %163, %179 : vector<16x32xf32>
    %cst_59 = arith.constant 9.99999974E-6 : f32
    %181 = vector.broadcast %cst_59 : f32 to vector<16x1xf32>
    %182 = arith.addf %178, %181 : vector<16x1xf32>
    %183 = math.rsqrt %182 : vector<16x1xf32>
    %184 = vector.broadcast %183 : vector<16x1xf32> to vector<16x32xf32>
    %185 = arith.mulf %180, %184 : vector<16x32xf32>
    %186 = vector.broadcast %165 : vector<1x32xf32> to vector<16x32xf32>
    %187 = arith.mulf %185, %186 : vector<16x32xf32>
    %188 = vector.broadcast %167 : vector<1x32xf32> to vector<16x32xf32>
    %189 = arith.addf %187, %188 : vector<16x32xf32>
    %190 = arith.truncf %189 : vector<16x32xf32> to vector<16x32xbf16>
    %c0_60 = arith.constant 0 : index
    %c0_61 = arith.constant 0 : index
    %c0_62 = arith.constant 0 : index
    %191 = vector.load %arg12[%c0_60, %c0_61, %c0_62] : memref<1x32x128xbf16, #tpu.memory_space<vmem>>, vector<1x32x128xbf16>
    %192 = vector.shape_cast %191 : vector<1x32x128xbf16> to vector<32x128xbf16>
    %cst_63 = arith.constant dense<0.000000e+00> : vector<16x128xf32>
    %193 = tpu.matmul %190, %192, %cst_63 {dimension_numbers = #tpu.dot_dimension_numbers<[1], [0], [0], [1], [0, 0, 1, 1], [], []>} : vector<16x32xbf16>, vector<32x128xbf16>, vector<16x128xf32> -> vector<16x128xf32>
    %c0_64 = arith.constant 0 : index
    %c0_65 = arith.constant 0 : index
    %c0_66 = arith.constant 0 : index
    %194 = vector.load %arg13[%c0_64, %c0_65, %c0_66] : memref<1x1x128xf32, #tpu.memory_space<vmem>>, vector<1x1x128xf32>
    %195 = vector.shape_cast %194 : vector<1x1x128xf32> to vector<1x128xf32>
    %196 = vector.broadcast %195 : vector<1x128xf32> to vector<16x128xf32>
    %197 = arith.addf %193, %196 : vector<16x128xf32>
    %cst_67 = arith.constant 1.702000e+00 : f32
    %198 = vector.broadcast %cst_67 : f32 to vector<16x128xf32>
    %199 = arith.mulf %198, %197 : vector<16x128xf32>
    %200 = arith.negf %199 : vector<16x128xf32>
    %201 = math.exp %200 : vector<16x128xf32>
    %cst_68 = arith.constant 1.000000e+00 : f32
    %202 = vector.broadcast %cst_68 : f32 to vector<16x128xf32>
    %203 = arith.addf %202, %201 : vector<16x128xf32>
    %204 = arith.divf %202, %203 : vector<16x128xf32>
    %205 = arith.mulf %197, %204 : vector<16x128xf32>
    %206 = arith.truncf %205 : vector<16x128xf32> to vector<16x128xbf16>
    %c0_69 = arith.constant 0 : index
    %c0_70 = arith.constant 0 : index
    %c0_71 = arith.constant 0 : index
    %207 = vector.load %arg14[%c0_69, %c0_70, %c0_71] : memref<1x128x32xbf16, #tpu.memory_space<vmem>>, vector<1x128x32xbf16>
    %208 = vector.shape_cast %207 : vector<1x128x32xbf16> to vector<128x32xbf16>
    %cst_72 = arith.constant dense<0.000000e+00> : vector<16x32xf32>
    %209 = tpu.matmul %206, %208, %cst_72 {dimension_numbers = #tpu.dot_dimension_numbers<[1], [0], [0], [1], [0, 0, 1, 1], [], []>} : vector<16x128xbf16>, vector<128x32xbf16>, vector<16x32xf32> -> vector<16x32xf32>
    %c0_73 = arith.constant 0 : index
    %c0_74 = arith.constant 0 : index
    %c0_75 = arith.constant 0 : index
    %210 = vector.load %arg15[%c0_73, %c0_74, %c0_75] : memref<1x1x32xf32, #tpu.memory_space<vmem>>, vector<1x1x32xf32>
    %211 = vector.shape_cast %210 : vector<1x1x32xf32> to vector<1x32xf32>
    %212 = vector.broadcast %211 : vector<1x32xf32> to vector<16x32xf32>
    %213 = arith.addf %209, %212 : vector<16x32xf32>
    %214 = arith.addf %163, %213 : vector<16x32xf32>
    %215 = vector.shape_cast %214 : vector<16x32xf32> to vector<2x8x32xf32>
    %c0_76 = arith.constant 0 : index
    %c0_77 = arith.constant 0 : index
    %c0_78 = arith.constant 0 : index
    %216 = vector.load %arg16[%c0_76, %c0_77, %c0_78] : memref<2x8x32xf32, #tpu.memory_space<vmem>>, vector<2x8x32xf32>
    tpu.vector_store %arg16[%c0_76, %c0_77, %c0_78], %215 {strides = array<i32>} : memref<2x8x32xf32, #tpu.memory_space<vmem>>, vector<2x8x32xf32>,
    return
  }
  func.func @transform_0(%arg0: i32, %arg1: i32) -> (i32, i32, i32) {
    %c0_i32 = arith.constant 0 : i32
    %c0_i32_0 = arith.constant 0 : i32
    %c0_i32_1 = arith.constant 0 : i32
    return %arg0, %c0_i32, %c0_i32_0 : i32, i32, i32
  }
  func.func @transform_1(%arg0: i32, %arg1: i32) -> (i32, i32) {
    %c0_i32 = arith.constant 0 : i32
    %c0_i32_0 = arith.constant 0 : i32
    %c0_i32_1 = arith.constant 0 : i32
    return %c0_i32, %c0_i32_0 : i32, i32
  }
  func.func @transform_2(%arg0: i32, %arg1: i32) -> (i32, i32, i32) {
    %c0_i32 = arith.constant 0 : i32
    %c0_i32_0 = arith.constant 0 : i32
    %c0_i32_1 = arith.constant 0 : i32
    return %arg1, %c0_i32, %c0_i32_0 : i32, i32, i32
  }
  func.func @transform_3(%arg0: i32, %arg1: i32) -> (i32, i32, i32) {
    %c0_i32 = arith.constant 0 : i32
    %c0_i32_0 = arith.constant 0 : i32
    %c0_i32_1 = arith.constant 0 : i32
    return %arg1, %c0_i32, %c0_i32_0 : i32, i32, i32
  }
  func.func @transform_4(%arg0: i32, %arg1: i32) -> (i32, i32, i32) {
    %c0_i32 = arith.constant 0 : i32
    %c0_i32_0 = arith.constant 0 : i32
    %c0_i32_1 = arith.constant 0 : i32
    return %arg1, %c0_i32, %c0_i32_0 : i32, i32, i32
  }
  func.func @transform_5(%arg0: i32, %arg1: i32) -> (i32, i32, i32) {
    %c0_i32 = arith.constant 0 : i32
    %c0_i32_0 = arith.constant 0 : i32
    %c0_i32_1 = arith.constant 0 : i32
    return %arg1, %c0_i32, %c0_i32_0 : i32, i32, i32
  }
  func.func @transform_6(%arg0: i32, %arg1: i32) -> (i32, i32, i32) {
    %c0_i32 = arith.constant 0 : i32
    %c0_i32_0 = arith.constant 0 : i32
    %c0_i32_1 = arith.constant 0 : i32
    return %arg1, %c0_i32, %c0_i32_0 : i32, i32, i32
  }
  func.func @transform_7(%arg0: i32, %arg1: i32) -> (i32, i32, i32) {
    %c0_i32 = arith.constant 0 : i32
    %c0_i32_0 = arith.constant 0 : i32
    %c0_i32_1 = arith.constant 0 : i32
    return %arg1, %c0_i32, %c0_i32_0 : i32, i32, i32
  }
  func.func @transform_8(%arg0: i32, %arg1: i32) -> (i32, i32, i32) {
    %c0_i32 = arith.constant 0 : i32
    %c0_i32_0 = arith.constant 0 : i32
    %c0_i32_1 = arith.constant 0 : i32
    return %arg1, %c0_i32, %c0_i32_0 : i32, i32, i32
  }
  func.func @transform_9(%arg0: i32, %arg1: i32) -> (i32, i32, i32) {
    %c0_i32 = arith.constant 0 : i32
    %c0_i32_0 = arith.constant 0 : i32
    %c0_i32_1 = arith.constant 0 : i32
    return %arg1, %c0_i32, %c0_i32_0 : i32, i32, i32
  }
  func.func @transform_10(%arg0: i32, %arg1: i32) -> (i32, i32, i32) {
    %c0_i32 = arith.constant 0 : i32
    %c0_i32_0 = arith.constant 0 : i32
    %c0_i32_1 = arith.constant 0 : i32
    return %arg1, %c0_i32, %c0_i32_0 : i32, i32, i32
  }
  func.func @transform_11(%arg0: i32, %arg1: i32) -> (i32, i32, i32) {
    %c0_i32 = arith.constant 0 : i32
    %c0_i32_0 = arith.constant 0 : i32
    %c0_i32_1 = arith.constant 0 : i32
    return %arg1, %c0_i32, %c0_i32_0 : i32, i32, i32
  }
  func.func @transform_12(%arg0: i32, %arg1: i32) -> (i32, i32, i32) {
    %c0_i32 = arith.constant 0 : i32
    %c0_i32_0 = arith.constant 0 : i32
    %c0_i32_1 = arith.constant 0 : i32
    return %arg1, %c0_i32, %c0_i32_0 : i32, i32, i32
  }
  func.func @transform_13(%arg0: i32, %arg1: i32) -> (i32, i32, i32) {
    %c0_i32 = arith.constant 0 : i32
    %c0_i32_0 = arith.constant 0 : i32
    %c0_i32_1 = arith.constant 0 : i32
    return %arg1, %c0_i32, %c0_i32_0 : i32, i32, i32
  }
  func.func @transform_14(%arg0: i32, %arg1: i32) -> (i32, i32, i32) {
    %c0_i32 = arith.constant 0 : i32
    %c0_i32_0 = arith.constant 0 : i32
    %c0_i32_1 = arith.constant 0 : i32
    return %arg0, %c0_i32, %c0_i32_0 : i32, i32, i32
  }
}

</mosaic_0001>

<bundles_post_ra>
// kernel: tpu_custom_call.1
= control target key start
LH: loop header
LB: loop body
LE: loop exit
PB: predicated region body
PF: predicated region fallthrough
CT: control target
= control target key end

     0   :  { %s3129_s0 = inlined_call_operand.vmem [shape: f32[2,8,32], index: 0, kind: input, shape index: {}]   ;;  %s3130_s1 = inlined_call_operand.vmem [shape: f32[8,32], index: 1, kind: input, shape index: {}]   ;;  %s3131_s2 = inlined_call_operand.vmem [shape: f32[2,1,32], index: 2, kind: input, shape index: {}]   ;;  %s3132_s3 = inlined_call_operand.vmem [shape: f32[2,1,32], index: 3, kind: input, shape index: {}]   ;;  %s3133_s4 = inlined_call_operand.vmem [shape: bf16[2,32,96], index: 4, kind: input, shape index: {}]   ;;  %s3134_s5 = inlined_call_operand.vmem [shape: f32[2,1,96], index: 5, kind: input, shape index: {}]   ;;  %s3135_s6 = inlined_call_operand.vmem [shape: bf16[2,32,32], index: 6, kind: input, shape index: {}]   ;;  %s3136_s7 = inlined_call_operand.vmem [shape: f32[2,1,32], index: 7, kind: input, shape index: {}]   ;;  %s3137_s8 = inlined_call_operand.vmem [shape: f32[2,1,32], index: 8, kind: input, shape index: {}]   ;;  %s3138_s9 = inlined_call_operand.vmem [shape: f32[2,1,32], index: 9, kind: input, shape index: {}]   ;;  %s3139_s10 = inlined_call_operand.vmem [shape: bf16[2,32,128], index: 10, kind: input, shape index: {}]   ;;  %s3140_s11 = inlined_call_operand.vmem [shape: f32[2,1,128], index: 11, kind: input, shape index: {}]   ;;  %s3141_s12 = inlined_call_operand.vmem [shape: bf16[2,128,32], index: 12, kind: input, shape index: {}]   ;;  %s3142_s13 = inlined_call_operand.vmem [shape: f32[2,1,32], index: 13, kind: input, shape index: {}]   ;;  %s3143_s14 = inlined_call_operand.hbm [shape: f32[2,8,32], index: 14, kind: output, shape index: {}]  }
   0x1   :  { %3147 = sst [smem:[#allocation9_spill]] %s3132_s3 }
   0x2   :  { %3148 = sst [smem:[#allocation10_spill]] %s3133_s4 }
   0x3   :  { %3149 = sst [smem:[#allocation11_spill]] %s3135_s6 }
   0x4   :  { %3150 = sst [smem:[#allocation12_spill]] %s3143_s14 }
   0x5   :  { %19 = vsyncpa [#allocation3], 0  ;;  %s2756_s29 = smov 0   ;;  %s2758_s30 = smov 0  }
   0x6   :  { %s2760_s15 = smov 0  }
   0x7 LB: > { %3151 = sst [smem:[#allocation5_spill]] %s2657_s30  ;;  %s34_s17 = sadd.s32 1, %s2657_s30  ;;  %s2661_s15 = sphi %s2760_s15, %s25_s15   ;;  %s2657_s30 = sphi %s2758_s30, %s3170_s30   ;;  %s2653_s29 = sphi %s2756_s29, %s3169_s29  }
   0x8   : > { %3152 = sst [smem:[#allocation6_spill]] %s2661_s15  ;;  %p35_p0 = scmp.ge.s32.totalorder %s34_s17, 2 }
   0x9   : > { %p2235_p1 = scmp.ge.s32.totalorder %s2661_s15, 1  ;;  %p530_p2 = scmp.lt.s32.totalorder %s2661_s15, 3 }
   0xa   : > { %s3172_s17 = smov (%p35_p0, %s34_s17), 0 }
   0xb   : > { %3153 = sst [smem:[#allocation7_spill]] %s3172_s17  ;;  %p531_p3 = pnand %p2235_p1, %p530_p2 }
   0xd   : > { %534 = sbr.rel (%p531_p3) target bundleno = 4029 (0xfbd), region = 76 }
  0x12   : > { %p621_p4 = scmp.lt.s32.totalorder %s2653_s29, 1  ;;  %s3155_s4 = sld [smem:[#allocation10_spill]] }
  0x13   : > { %s3156_s6 = sld [smem:[#allocation11_spill]]  ;;  %p2244_p5 = scmp.ne.s32.totalorder %s2653_s29, 0 }
  0x14   : > { %s2775_s18 = scalar_select %p621_p4, %s2653_s29, 1 }
  0x16   : > { %s2292_s25 = sshll.u32 %s2775_s18, 4  ;;  %s645_s3 = scalar_lea.vmem %s3137_s8, %s2775_s18 }
  0x17   : > { %s648_s28 = scalar_lea.vmem %s3138_s9, %s2775_s18  ;;  %s664_s26 = scalar_lea.vmem %s3142_s13, %s2775_s18 }
  0x18   : > { %s2793_s16 = scalar_lea.vmem %s3155_s4, %s2292_s25  ;;  %s2815_s4 = scalar_lea.vmem %s3139_s10, %s2292_s25 }
  0x19   : > { %s2798_s14 = scalar_lea.vmem %s3156_s6, %s2292_s25  ;;  %s656_s6 = scalar_lea.vmem %s3140_s11, %s2775_s18 }
  0x1a   : > { %3157 = sst [smem:[#allocation8_spill]] %s2798_s14  ;;  %s2295_s14 = sshll.u32 %s2775_s18, 6 }
  0x1b   : > { %s2825_s22 = scalar_lea.vmem %s3141_s12, %s2295_s14  ;;  %670 = sbr.rel (%p2244_p5) target bundleno = 37 (0x25), region = 80 }
  0x20   : > { %v671_v0 = vld [vmem:[%s3129_s0] sm:$0xff]  ;;  %vm676_vm0 = vcmask 261120   ;;  %v672_v2 = vld [vmem:[%s3129_s0 + $0x8] sm:$0xff] }
  0x21   : > { %v673_v1 = vld [vmem:[%s3130_s1] sm:$0xff] }
  0x22   : > { %v674_v3 = vadd.f32 %v673_v1, %v671_v0  ;;  %v675_v4 = vadd.f32 %v673_v1, %v672_v2 }
  0x24   : > { %677 = vst.msk [vmem:[#allocation2] sm:$0xff] %vm676_vm0, %v674_v3  ;;  %678 = vst.msk [vmem:[#allocation2 + $0x8] sm:$0xff] %vm676_vm0, %v675_v4 }
  0x25 PF: > { %vm689_vm1 = vcmask 261120   ;;  %v2549_v19 = vld [vmem:[%s2793_s16 + $0x8] sm:$0xff]   ;;  %v2663_v20 = vmov 0.0   ;;  %vm2664_vm2 = vmmov 0   ;;  %v2550_v21 = vld [vmem:[%s2793_s16] sm:$0xff]   ;;  %s3158_s16 = scalar_lea.vmem %s3131_s2, %s2775_s18  ;;  %s3159_s24 = sld [smem:[#allocation9_spill]]  ;;  %v681_v52 = vlaneseq }
  0x26   : > { %2346 = vmatprep.subr.bf16.mxu0 %v2663_v20  ;;  %2350 = vmatprep.mubr.msk.bf16.mxu0 %vm2664_vm2, %v2663_v20  ;;  %v2245_v30 = vld [vmem:[%s3158_s16] ss:$0 sm:$0xff]  ;;  %s3161_s25 = scalar_lea.vmem %s3134_s5, %s2775_s18  ;;  %s2665_s20 = smov 96   ;;  %vm806_vm3 = vcmask 64512   ;;  %vm935_vm5 = vcmask 1043456   ;;  %vm1725_vm6 = vcmask 130048  }
  0x27   : > { %2347 = vmatpush3.bf16.msra.mxu0 %v2549_v19  ;;  %2366 = vmatprep.subr.bf16.mxu1 %v2663_v20  ;;  %v2247_v39 = vld [vmem:[%s3161_s25] ss:$0 sm:$0xff]  ;;  %v682_v53 = vshrl.u32 %v681_v52, 7  ;;  %v684_v54 = vand.u32 127, %v681_v52  ;;  %s2666_s30 = smov 64   ;;  %s2667_s17 = smov 88  }
  0x28   : > { %2348 = vmatprep.subr.bf16.mxu0 %v2663_v20  ;;  %2368 = vmatprep.mubr.msk.bf16.mxu1 %vm2664_vm2, %v2663_v20  ;;  %s2668_s14 = smov 120   ;;  %s2669_s29 = smov 56   ;;  %vm1728_vm7 = vcmask 195584  }
  0x29   : > { %vm685_vm4 = vcmp.gt.s32.totalorder %v684_v54, %v682_v53  ;;  %s2670_s16 = smov 80   ;;  %s2671_s15 = smov 112  }
  0x2a   : > { %v2899_v56 = vsel %vm685_vm4, -1e+30, %v2663_v20  ;;  %s2672_s21 = smov 48   ;;  %s2675_s27 = smov 40  }
  0x2b   : > { %v2840_v5 = vld [vmem:[#allocation2] sm:$0xff]  ;;  %v2842_v6 = vld [vmem:[#allocation2 + $0x8] sm:$0xff]  ;;  %2349 = vmatpush3.bf16.msra.mxu0 %v2550_v21  ;;  %s3160_s23 = scalar_lea.vmem %s3159_s24, %s2775_s18  ;;  %s2673_s24 = smov 72  }
  0x2c   : > { %v690_v7 = vsel %vm689_vm1, %v2840_v5, 0.0  ;;  %v693_v8 = vsel %vm689_vm1, %v2842_v6, 0.0  ;;  %2354 = vmatprep.subr.bf16.mxu0 %v2663_v20  ;;  %v2246_v34 = vld [vmem:[%s3160_s23] ss:$0 sm:$0xff]  ;;  %s2674_s23 = smov 104   ;;  %s2676_s19 = smov 8  }
  0x2d   : > { %691 = vadd.xlane.f32.xlu0 %v690_v7  ;;  %s2677_s25 = smov 16  }
  0x31   : > { %694 = vadd.xlane.f32.xlu0 %v693_v8 }
  0xb6   : > { %v692_v9 = vpop.xlane.xlu0 %691 }
  0xb7   : > { %v697_v10 = vmul.f32 0.03125, %v692_v9 }
  0xb9   : > { %v699_v11 = vsub.f32 %v2840_v5, %v697_v10 }
  0xba   : > { %v695_v12 = vpop.xlane.xlu0 %694 }
  0xbb   : > { %v698_v13 = vmul.f32 0.03125, %v695_v12  ;;  %v701_v14 = vmul.f32 %v699_v11, %v699_v11 }
  0xbd   : > { %v700_v15 = vsub.f32 %v2842_v6, %v698_v13  ;;  %v703_v16 = vsel %vm689_vm1, %v701_v14, 0.0 }
  0xbe   : > { %704 = vadd.xlane.f32.xlu1 %v703_v16 }
  0xbf   : > { %v702_v17 = vmul.f32 %v700_v15, %v700_v15 }
  0xc1   : > { %v706_v18 = vsel %vm689_vm1, %v702_v17, 0.0 }
  0xc2   : > { %707 = vadd.xlane.f32.xlu1 %v706_v18 }
 0x147   : > { %v705_v22 = vpop.xlane.xlu1 %704 }
 0x148   : > { %v709_v23 = vmul.f32 0.03125, %v705_v22 }
 0x14a   : > { %v711_v24 = vadd.f32 1e-05, %v709_v23 }
 0x14b   : > { %v708_v25 = vpop.xlane.xlu1 %707 }
 0x14c   : > { %2563 = vrsqrt.f32 %v711_v24  ;;  %v710_v26 = vmul.f32 0.03125, %v708_v25 }
 0x14e   : > { %v712_v27 = vadd.f32 1e-05, %v710_v26 }
 0x150   : > { %2565 = vrsqrt.f32 %v712_v27 }
 0x159   : > { %v2564_v28 = vpop.eup %2563 }
 0x15a   : > { %v715_v29 = vmul.f32 %v2564_v28, %v699_v11 }
 0x15c   : > { %v723_v33 = vmul.f32 %v2245_v30, %v715_v29 }
 0x15d   : > { %v2566_v31 = vpop.eup %2565 }
 0x15e   : > { %v716_v32 = vmul.f32 %v2566_v31, %v700_v15  ;;  %v731_v36 = vadd.f32 %v2246_v34, %v723_v33 }
 0x160   : > { %v724_v35 = vmul.f32 %v2245_v30, %v716_v32 }
 0x162   : > { %v732_v37 = vadd.f32 %v2246_v34, %v724_v35 }
 0x164   : > { %v733_v38 = vpack.c.bf16 %v732_v37, %v731_v36 }
 0x166   : > { %2351 = vmatmul.mubr.msk.bf16.vlgmr.msra.gmra.mxu0 %vm689_vm1, %v733_v38 }
 0x167   : > { %2356 = vmatprep.mubr.msk.bf16.mxu0 %vm2664_vm2, %v2663_v20 }
 0x226   : > { %v794_v40 = vpop.f32.mrf.mxu0 }
 0x227   : > { %v795_v41 = vadd.f32 %v2247_v39, %v794_v40 }
 0x228   : > { %v2352_v42 = vpop.f32.mrf.mxu0 }
 0x229   : > { %v2880_v43 = vpack.c.bf16 %v795_v41, %v795_v41 }
 0x22a   : > { %v797_v44 = vpop.f32.mrf.mxu0 }
 0x22b   : > { %v798_v45 = vadd.f32 %v2247_v39, %v797_v44  ;;  %804 = vrot.lane.b32.xlu0 %v2880_v43, %s2665_s20 }
 0x22c   : > { %v2353_v46 = vpop.f32.mrf.mxu0 }
 0x22d   : > { %v2883_v47 = vpack.c.bf16 %v798_v45, %v798_v45 }
 0x22f   : > { %854 = vrot.lane.b32.xlu1 %v2883_v47, %s2665_s20  ;;  %s3162_s20 = sld [smem:[#allocation8_spill]] }
 0x29d   : > { %v805_v48 = vpop.permute.xlu0 %804 }
 0x29e   : > { %v811_v49 = vsel %vm806_vm3, %v805_v48, 0 }
 0x29f   : > { %2355 = vmatpush3.bf16.xpose.msra.mxu0 %v811_v49 }
 0x2a0   : > { %2360 = vmatprep.subr.bf16.mxu0 %v2663_v20 }
 0x2a1   : > { %v855_v50 = vpop.permute.xlu1 %854 }
 0x2a2   : > { %v860_v51 = vsel %vm806_vm3, %v855_v50, 0 }
 0x2a6   : > { %2357 = vmatmul.mubr.msk.bf16.vlgmr.msra.gmra.mxu0 %vm806_vm3, %v2880_v43 }
 0x2a7   : > { %2361 = vmatpush3.bf16.xpose.msra.mxu0 %v860_v51  ;;  %2362 = vmatprep.mubr.msk.bf16.mxu0 %vm2664_vm2, %v2663_v20 }
 0x2a8   : > { %2372 = vmatprep.subr.bf16.mxu0 %v2663_v20 }
 0x2ae   : > { %2363 = vmatmul.mubr.msk.bf16.vlgmr.msra.gmra.mxu0 %vm806_vm3, %v2883_v47 }
 0x2af   : > { %2374 = vmatprep.mubr.msk.bf16.mxu0 %vm2664_vm2, %v2663_v20 }
 0x366   : > { %v847_v55 = vpop.f32.mrf.mxu0 }
 0x367   : > { %v902_v57 = vmul.f32 0.35355338, %v847_v55 }
 0x368   : > { %v2358_v58 = vpop.f32.mrf.mxu0 }
 0x369   : > { %v904_v59 = vadd.f32 %v902_v57, %v2899_v56 }
 0x36a   : > { %v850_v60 = vpop.f32.mrf.mxu0 }
 0x36b   : > { %v906_v61 = vsel %vm806_vm3, %v904_v59, -inf }
 0x36c   : > { %907 = vmax.xlane.f32.xlu1 %v906_v61  ;;  %v2359_v62 = vpop.f32.mrf.mxu0 }
 0x36e   : > { %v896_v63 = vpop.f32.mrf.mxu0 }
 0x36f   : > { %v903_v0 = vmul.f32 0.35355338, %v896_v63 }
 0x370   : > { %v2364_v1 = vpop.f32.mrf.mxu0 }
 0x371   : > { %v905_v2 = vadd.f32 %v903_v0, %v2899_v56 }
 0x372   : > { %v899_v3 = vpop.f32.mrf.mxu0 }
 0x373   : > { %v909_v4 = vsel %vm806_vm3, %v905_v2, -inf }
 0x374   : > { %910 = vmax.xlane.f32.xlu0 %v909_v4  ;;  %v2365_v7 = vpop.f32.mrf.mxu0 }
 0x37d   : > { %979 = vrot.lane.b32.xlu1 %v2883_v47, %s2666_s30 }
 0x381   : > { %1029 = vrot.lane.b32.xlu1 %v2880_v43, %s2667_s17 }
 0x3f5   : > { %v908_v8 = vpop.xlane.xlu1 %907 }
 0x3f6   : > { %v912_v9 = vsub.f32 %v904_v59, %v908_v8 }
 0x3f8   : > { %v914_v10 = vmul.f32 1.442695, %v912_v9 }
 0x3f9   : > { %v980_v11 = vpop.permute.xlu1 %979 }
 0x3fa   : > { %2567 = vpow2.f32 %v914_v10  ;;  %v985_v12 = vsel %vm935_vm5, %v980_v11, 0 }
 0x3fb   : > { %2373 = vmatpush3.bf16.msra.mxu0 %v985_v12 }
 0x3fc   : > { %2384 = vmatprep.subr.bf16.mxu0 %v2663_v20 }
 0x3fd   : > { %v911_v13 = vpop.xlane.xlu0 %910  ;;  %v1030_v22 = vpop.permute.xlu1 %1029 }
 0x3fe   : > { %v913_v14 = vsub.f32 %v905_v2, %v911_v13  ;;  %v1035_v29 = vsel %vm806_vm3, %v1030_v22, 0 }
 0x400   : > { %v916_v15 = vmul.f32 1.442695, %v913_v14 }
 0x402   : > { %2569 = vpow2.f32 %v916_v15 }
 0x407   : > { %v2568_v16 = vpop.eup %2567 }
 0x408   : > { %v918_v17 = vsel %vm806_vm3, %v2568_v16, 0.0 }
 0x409   : > { %919 = vadd.xlane.f32.xlu0 %v918_v17 }
 0x40f   : > { %v2570_v18 = vpop.eup %2569 }
 0x410   : > { %v921_v19 = vsel %vm806_vm3, %v2570_v18, 0.0 }
 0x411   : > { %922 = vadd.xlane.f32.xlu1 %v921_v19 }
 0x41f   : > { %930 = vrot.lane.b32.xlu0 %v2880_v43, %s2666_s30  ;;  %s2678_s30 = smov 24  }
 0x422   : > { %1079 = vrot.lane.b32.xlu1 %v2883_v47, %s2667_s17 }
 0x423   : > { %1027 = vrot.lane.b32.xlu0 %v2880_v43, %s2668_s14 }
 0x426   : > { %1077 = vrot.lane.b32.xlu1 %v2883_v47, %s2668_s14 }
 0x492   : > { %v920_v21 = vpop.xlane.xlu0 %919 }
 0x493   : > { %2571 = vrcp.f32 %v920_v21 }
 0x496   : > { %v931_v23 = vpop.permute.xlu0 %930 }
 0x497   : > { %v937_v24 = vsel %vm935_vm5, %v931_v23, 0 }
 0x498   : > { %2367 = vmatpush3.bf16.msra.mxu1 %v937_v24 }
 0x499   : > { %2378 = vmatprep.subr.bf16.mxu1 %v2663_v20 }
 0x49a   : > { %v923_v25 = vpop.xlane.xlu1 %922  ;;  %v1028_v34 = vpop.permute.xlu0 %1027 }
 0x49b   : > { %2573 = vrcp.f32 %v923_v25 }
 0x49e   : > { %v1080_v32 = vpop.permute.xlu1 %1079 }
 0x49f   : > { %v1085_v35 = vsel %vm806_vm3, %v1080_v32, 0 }
 0x4a0   : > { %v2572_v26 = vpop.eup %2571 }
 0x4a1   : > { %v926_v27 = vmul.f32 %v2572_v26, %v2568_v16 }
 0x4a2   : > { %v1078_v36 = vpop.permute.xlu1 %1077 }
 0x4a3   : > { %v928_v28 = vpack.c.bf16 %v926_v27, %v926_v27 }
 0x4a5   : > { %2369 = vmatmul.mubr.msk.bf16.vlgmr.msra.gmra.mxu1 %vm806_vm3, %v928_v28 }
 0x4a6   : > { %2379 = vmatpush3.bf16.xpose.msra.mxu1 %v1035_v29  ;;  %2380 = vmatprep.mubr.msk.bf16.mxu1 %vm2664_vm2, %v2663_v20 }
 0x4a7   : > { %2390 = vmatprep.subr.bf16.mxu1 %v2663_v20 }
 0x4a8   : > { %v2574_v30 = vpop.eup %2573 }
 0x4a9   : > { %v927_v31 = vmul.f32 %v2574_v30, %v2570_v18 }
 0x4ab   : > { %v929_v33 = vpack.c.bf16 %v927_v31, %v927_v31 }
 0x4ad   : > { %2375 = vmatmul.mubr.msk.bf16.vlgmr.msra.gmra.mxu0 %vm806_vm3, %v929_v33  ;;  %2381 = vmatmul.mubr.msk.bf16.vlgmr.msra.gmra.mxu1 %vm806_vm3, %v1028_v34 }
 0x4ae   : > { %2385 = vmatpush3.bf16.xpose.msra.mxu0 %v1085_v35  ;;  %2386 = vmatprep.mubr.msk.bf16.mxu0 %vm2664_vm2, %v2663_v20 }
 0x4af   : > { %2396 = vmatprep.subr.bf16.mxu0 %v2663_v20  ;;  %2392 = vmatprep.mubr.msk.bf16.mxu1 %vm2664_vm2, %v2663_v20 }
 0x4b5   : > { %2387 = vmatmul.mubr.msk.bf16.vlgmr.msra.gmra.mxu0 %vm806_vm3, %v1078_v36 }
 0x4b6   : > { %2398 = vmatprep.mubr.msk.bf16.mxu0 %vm2664_vm2, %v2663_v20 }
 0x565   : > { %v2933_v37 = vpop.f32.mrf.mxu1 }
 0x567   : > { %v2370_v38 = vpop.f32.mrf.mxu1 }
 0x569   : > { %v976_v39 = vpop.f32.mrf.mxu1 }
 0x56b   : > { %v2371_v40 = vpop.f32.mrf.mxu1 }
 0x56d   : > { %v2935_v41 = vpop.f32.mrf.mxu0  ;;  %v1071_v42 = vpop.f32.mrf.mxu1 }
 0x56e   : > { %v1127_v44 = vmul.f32 0.35355338, %v1071_v42 }
 0x56f   : > { %v2376_v45 = vpop.f32.mrf.mxu0  ;;  %v2382_v46 = vpop.f32.mrf.mxu1 }
 0x570   : > { %v1129_v48 = vadd.f32 %v1127_v44, %v2899_v56 }
 0x571   : > { %v1024_v49 = vpop.f32.mrf.mxu0  ;;  %v1074_v50 = vpop.f32.mrf.mxu1 }
 0x572   : > { %v1131_v51 = vsel %vm806_vm3, %v1129_v48, -inf }
 0x573   : > { %1132 = vmax.xlane.f32.xlu0 %v1131_v51  ;;  %v2377_v52 = vpop.f32.mrf.mxu0  ;;  %v2383_v53 = vpop.f32.mrf.mxu1 }
 0x575   : > { %v1121_v54 = vpop.f32.mrf.mxu0 }
 0x576   : > { %v1128_v55 = vmul.f32 0.35355338, %v1121_v54 }
 0x577   : > { %v2388_v57 = vpop.f32.mrf.mxu0 }
 0x578   : > { %v1130_v58 = vadd.f32 %v1128_v55, %v2899_v56 }
 0x579   : > { %v1124_v59 = vpop.f32.mrf.mxu0 }
 0x57a   : > { %v1134_v60 = vsel %vm806_vm3, %v1130_v58, -inf }
 0x57b   : > { %1135 = vmax.xlane.f32.xlu1 %v1134_v60  ;;  %v2389_v61 = vpop.f32.mrf.mxu0 }
 0x58c   : > { %1203 = vrot.lane.b32.xlu1 %v2883_v47, %s2669_s29 }
 0x590   : > { %1253 = vrot.lane.b32.xlu1 %v2880_v43, %s2670_s16 }
 0x594   : > { %1303 = vrot.lane.b32.xlu1 %v2883_v47, %s2670_s16 }
 0x598   : > { %1301 = vrot.lane.b32.xlu1 %v2883_v47, %s2671_s15 }
 0x5fc   : > { %v1133_v62 = vpop.xlane.xlu0 %1132 }
 0x5fd   : > { %v1137_v63 = vsub.f32 %v1129_v48, %v1133_v62 }
 0x5ff   : > { %v1139_v0 = vmul.f32 1.442695, %v1137_v63 }
 0x601   : > { %2575 = vpow2.f32 %v1139_v0 }
 0x604   : > { %v1136_v1 = vpop.xlane.xlu1 %1135 }
 0x605   : > { %v1138_v2 = vsub.f32 %v1130_v58, %v1136_v1 }
 0x607   : > { %v1141_v3 = vmul.f32 1.442695, %v1138_v2 }
 0x608   : > { %v1204_v4 = vpop.permute.xlu1 %1203 }
 0x609   : > { %2577 = vpow2.f32 %v1141_v3  ;;  %v1209_v7 = vsel %vm935_vm5, %v1204_v4, 0 }
 0x60a   : > { %2397 = vmatpush3.bf16.msra.mxu0 %v1209_v7 }
 0x60b   : > { %2408 = vmatprep.subr.bf16.mxu0 %v2663_v20 }
 0x60c   : > { %v1254_v18 = vpop.permute.xlu1 %1253 }
 0x60d   : > { %v1259_v21 = vsel %vm806_vm3, %v1254_v18, 0 }
 0x60e   : > { %v2576_v8 = vpop.eup %2575 }
 0x60f   : > { %v1143_v9 = vsel %vm806_vm3, %v2576_v8, 0.0 }
 0x610   : > { %1144 = vadd.xlane.f32.xlu0 %v1143_v9  ;;  %v1304_v24 = vpop.permute.xlu1 %1303 }
 0x611   : > { %v1309_v27 = vsel %vm806_vm3, %v1304_v24, 0 }
 0x614   : > { %v1302_v28 = vpop.permute.xlu1 %1301 }
 0x616   : > { %v2578_v10 = vpop.eup %2577 }
 0x617   : > { %v1146_v11 = vsel %vm806_vm3, %v2578_v10, 0.0 }
 0x618   : > { %1147 = vadd.xlane.f32.xlu0 %v1146_v11 }
 0x62e   : > { %1155 = vrot.lane.b32.xlu0 %v2880_v43, %s2669_s29  ;;  %s3163_s29 = scalar_lea.vmem %s3136_s7, %s2775_s18 }
 0x632   : > { %1251 = vrot.lane.b32.xlu0 %v2880_v43, %s2671_s15 }
 0x699   : > { %v1145_v12 = vpop.xlane.xlu0 %1144 }
 0x69a   : > { %2579 = vrcp.f32 %v1145_v12 }
 0x6a1   : > { %v1148_v13 = vpop.xlane.xlu0 %1147 }
 0x6a2   : > { %2581 = vrcp.f32 %v1148_v13 }
 0x6a5   : > { %v1156_v14 = vpop.permute.xlu0 %1155 }
 0x6a6   : > { %v1161_v15 = vsel %vm935_vm5, %v1156_v14, 0 }
 0x6a7   : > { %v2580_v16 = vpop.eup %2579  ;;  %2391 = vmatpush3.bf16.msra.mxu1 %v1161_v15 }
 0x6a8   : > { %2402 = vmatprep.subr.bf16.mxu1 %v2663_v20  ;;  %v1151_v17 = vmul.f32 %v2580_v16, %v2576_v8 }
 0x6a9   : > { %v1252_v26 = vpop.permute.xlu0 %1251 }
 0x6aa   : > { %v1153_v19 = vpack.c.bf16 %v1151_v17, %v1151_v17 }
 0x6ac   : > { %2393 = vmatmul.mubr.msk.bf16.vlgmr.msra.gmra.mxu1 %vm806_vm3, %v1153_v19 }
 0x6ad   : > { %2403 = vmatpush3.bf16.xpose.msra.mxu1 %v1259_v21  ;;  %2404 = vmatprep.mubr.msk.bf16.mxu1 %vm2664_vm2, %v2663_v20 }
 0x6ae   : > { %2414 = vmatprep.subr.bf16.mxu1 %v2663_v20 }
 0x6af   : > { %v2582_v22 = vpop.eup %2581 }
 0x6b0   : > { %v1152_v23 = vmul.f32 %v2582_v22, %v2578_v10 }
 0x6b2   : > { %v1154_v25 = vpack.c.bf16 %v1152_v23, %v1152_v23 }
 0x6b4   : > { %2399 = vmatmul.mubr.msk.bf16.vlgmr.msra.gmra.mxu0 %vm806_vm3, %v1154_v25  ;;  %2405 = vmatmul.mubr.msk.bf16.vlgmr.msra.gmra.mxu1 %vm806_vm3, %v1252_v26 }
 0x6b5   : > { %2409 = vmatpush3.bf16.xpose.msra.mxu0 %v1309_v27  ;;  %2410 = vmatprep.mubr.msk.bf16.mxu0 %vm2664_vm2, %v2663_v20 }
 0x6b6   : > { %2420 = vmatprep.subr.bf16.mxu0 %v2663_v20  ;;  %2416 = vmatprep.mubr.msk.bf16.mxu1 %vm2664_vm2, %v2663_v20 }
 0x6bc   : > { %2411 = vmatmul.mubr.msk.bf16.vlgmr.msra.gmra.mxu0 %vm806_vm3, %v1302_v28 }
 0x6bd   : > { %2422 = vmatprep.mubr.msk.bf16.mxu0 %vm2664_vm2, %v2663_v20 }
 0x76c   : > { %v2969_v29 = vpop.f32.mrf.mxu1 }
 0x76e   : > { %v2394_v30 = vpop.f32.mrf.mxu1 }
 0x770   : > { %v1200_v31 = vpop.f32.mrf.mxu1 }
 0x772   : > { %v2395_v32 = vpop.f32.mrf.mxu1 }
 0x774   : > { %v2971_v33 = vpop.f32.mrf.mxu0  ;;  %v1295_v34 = vpop.f32.mrf.mxu1 }
 0x775   : > { %v2534_v35 = vpack.i.bf16 %v2971_v33, %v2969_v29  ;;  %v1351_v36 = vmul.f32 0.35355338, %v1295_v34 }
 0x776   : > { %v2400_v38 = vpop.f32.mrf.mxu0  ;;  %v2406_v39 = vpop.f32.mrf.mxu1 }
 0x777   : > { %v1353_v40 = vadd.f32 %v1351_v36, %v2899_v56 }
 0x778   : > { %v1248_v42 = vpop.f32.mrf.mxu0  ;;  %v1298_v44 = vpop.f32.mrf.mxu1 }
 0x779   : > { %v1355_v45 = vsel %vm806_vm3, %v1353_v40, -inf }
 0x77a   : > { %1356 = vmax.xlane.f32.xlu0 %v1355_v45  ;;  %v2401_v46 = vpop.f32.mrf.mxu0  ;;  %v2407_v48 = vpop.f32.mrf.mxu1 }
 0x77c   : > { %v1345_v49 = vpop.f32.mrf.mxu0 }
 0x77d   : > { %v1352_v50 = vmul.f32 0.35355338, %v1345_v49 }
 0x77e   : > { %v2412_v51 = vpop.f32.mrf.mxu0 }
 0x77f   : > { %v1354_v52 = vadd.f32 %v1352_v50, %v2899_v56 }
 0x780   : > { %v1348_v53 = vpop.f32.mrf.mxu0 }
 0x781   : > { %v1358_v54 = vsel %vm806_vm3, %v1354_v52, -inf }
 0x782   : > { %1359 = vmax.xlane.f32.xlu1 %v1358_v54  ;;  %v2413_v55 = vpop.f32.mrf.mxu0 }
 0x793   : > { %1427 = vrot.lane.b32.xlu1 %v2883_v47, %s2672_s21 }
 0x797   : > { %1477 = vrot.lane.b32.xlu1 %v2880_v43, %s2673_s24 }
 0x79b   : > { %1527 = vrot.lane.b32.xlu1 %v2883_v47, %s2673_s24 }
 0x79f   : > { %1525 = vrot.lane.b32.xlu1 %v2883_v47, %s2674_s23 }
 0x803   : > { %v1357_v57 = vpop.xlane.xlu0 %1356 }
 0x804   : > { %v1361_v58 = vsub.f32 %v1353_v40, %v1357_v57 }
 0x806   : > { %v1363_v59 = vmul.f32 1.442695, %v1361_v58 }
 0x808   : > { %2583 = vpow2.f32 %v1363_v59 }
 0x80b   : > { %v1360_v60 = vpop.xlane.xlu1 %1359 }
 0x80c   : > { %v1362_v61 = vsub.f32 %v1354_v52, %v1360_v60 }
 0x80e   : > { %v1365_v62 = vmul.f32 1.442695, %v1362_v61 }
 0x80f   : > { %v1428_v63 = vpop.permute.xlu1 %1427 }
 0x810   : > { %2585 = vpow2.f32 %v1365_v62  ;;  %v1433_v0 = vsel %vm935_vm5, %v1428_v63, 0 }
 0x811   : > { %2421 = vmatpush3.bf16.msra.mxu0 %v1433_v0 }
 0x812   : > { %2432 = vmatprep.subr.bf16.mxu0 %v2663_v20 }
 0x813   : > { %v1478_v13 = vpop.permute.xlu1 %1477 }
 0x814   : > { %v1483_v15 = vsel %vm806_vm3, %v1478_v13, 0 }
 0x815   : > { %v2584_v1 = vpop.eup %2583 }
 0x816   : > { %v1367_v2 = vsel %vm806_vm3, %v2584_v1, 0.0 }
 0x817   : > { %1368 = vadd.xlane.f32.xlu0 %v1367_v2  ;;  %v1528_v18 = vpop.permute.xlu1 %1527 }
 0x818   : > { %v1533_v22 = vsel %vm806_vm3, %v1528_v18, 0 }
 0x81b   : > { %v1526_v23 = vpop.permute.xlu1 %1525 }
 0x81d   : > { %v2586_v3 = vpop.eup %2585 }
 0x81e   : > { %v1370_v4 = vsel %vm806_vm3, %v2586_v3, 0.0 }
 0x81f   : > { %1371 = vadd.xlane.f32.xlu0 %v1370_v4 }
 0x835   : > { %1379 = vrot.lane.b32.xlu0 %v2880_v43, %s2672_s21 }
 0x839   : > { %1475 = vrot.lane.b32.xlu0 %v2880_v43, %s2674_s23  ;;  %s2679_s23 = smov [#allocation2]  }
 0x8a0   : > { %v1369_v7 = vpop.xlane.xlu0 %1368 }
 0x8a1   : > { %2587 = vrcp.f32 %v1369_v7 }
 0x8a8   : > { %v1372_v8 = vpop.xlane.xlu0 %1371 }
 0x8a9   : > { %2589 = vrcp.f32 %v1372_v8 }
 0x8ac   : > { %v1380_v9 = vpop.permute.xlu0 %1379 }
 0x8ad   : > { %v1385_v10 = vsel %vm935_vm5, %v1380_v9, 0  ;;  %v2551_v9 = vld [vmem:[%s3162_s20 + $0x8] sm:$0xff]  }
 0x8ae   : > { %v2588_v11 = vpop.eup %2587  ;;  %2415 = vmatpush3.bf16.msra.mxu1 %v1385_v10  ;;  %v2552_v10 = vld [vmem:[%s3162_s20] sm:$0xff]  }
 0x8af   : > { %2426 = vmatprep.subr.bf16.mxu1 %v2663_v20  ;;  %v1375_v12 = vmul.f32 %v2588_v11, %v2584_v1 }
 0x8b0   : > { %v1476_v21 = vpop.permute.xlu0 %1475 }
 0x8b1   : > { %v1377_v14 = vpack.c.bf16 %v1375_v12, %v1375_v12 }
 0x8b3   : > { %2417 = vmatmul.mubr.msk.bf16.vlgmr.msra.gmra.mxu1 %vm806_vm3, %v1377_v14 }
 0x8b4   : > { %2427 = vmatpush3.bf16.xpose.msra.mxu1 %v1483_v15  ;;  %2428 = vmatprep.mubr.msk.bf16.mxu1 %vm2664_vm2, %v2663_v20 }
 0x8b5   : > { %2438 = vmatprep.subr.bf16.mxu1 %v2663_v20 }
 0x8b6   : > { %v2590_v16 = vpop.eup %2589 }
 0x8b7   : > { %v1376_v17 = vmul.f32 %v2590_v16, %v2586_v3 }
 0x8b9   : > { %v1378_v19 = vpack.c.bf16 %v1376_v17, %v1376_v17 }
 0x8bb   : > { %2423 = vmatmul.mubr.msk.bf16.vlgmr.msra.gmra.mxu0 %vm806_vm3, %v1378_v19  ;;  %2429 = vmatmul.mubr.msk.bf16.vlgmr.msra.gmra.mxu1 %vm806_vm3, %v1476_v21 }
 0x8bc   : > { %2433 = vmatpush3.bf16.xpose.msra.mxu0 %v1533_v22  ;;  %2434 = vmatprep.mubr.msk.bf16.mxu0 %vm2664_vm2, %v2663_v20 }
 0x8bd   : > { %2444 = vmatprep.subr.bf16.mxu0 %v2663_v20  ;;  %2440 = vmatprep.mubr.msk.bf16.mxu1 %vm2664_vm2, %v2663_v20 }
 0x8c3   : > { %2435 = vmatmul.mubr.msk.bf16.vlgmr.msra.gmra.mxu0 %vm806_vm3, %v1526_v23 }
 0x8c4   : > { %2446 = vmatprep.mubr.msk.bf16.mxu0 %vm2664_vm2, %v2663_v20 }
 0x973   : > { %v1421_v24 = vpop.f32.mrf.mxu1 }
 0x975   : > { %v2418_v25 = vpop.f32.mrf.mxu1 }
 0x977   : > { %v1424_v26 = vpop.f32.mrf.mxu1 }
 0x979   : > { %v2419_v27 = vpop.f32.mrf.mxu1 }
 0x97b   : > { %v1469_v28 = vpop.f32.mrf.mxu0  ;;  %v1519_v30 = vpop.f32.mrf.mxu1 }
 0x97c   : > { %v1575_v31 = vmul.f32 0.35355338, %v1519_v30  ;;  %v2539_v53 = vpack.i.bf16 %v1469_v28, %v1421_v24 }
 0x97d   : > { %v2424_v32 = vpop.f32.mrf.mxu0  ;;  %v2430_v34 = vpop.f32.mrf.mxu1 }
 0x97e   : > { %v1577_v36 = vadd.f32 %v1575_v31, %v2899_v56 }
 0x97f   : > { %v1472_v38 = vpop.f32.mrf.mxu0  ;;  %v1522_v39 = vpop.f32.mrf.mxu1 }
 0x980   : > { %v1579_v40 = vsel %vm806_vm3, %v1577_v36, -inf }
 0x981   : > { %1580 = vmax.xlane.f32.xlu0 %v1579_v40  ;;  %v2425_v42 = vpop.f32.mrf.mxu0  ;;  %v2431_v44 = vpop.f32.mrf.mxu1 }
 0x983   : > { %v1569_v45 = vpop.f32.mrf.mxu0 }
 0x984   : > { %v1576_v46 = vmul.f32 0.35355338, %v1569_v45 }
 0x985   : > { %v2436_v48 = vpop.f32.mrf.mxu0 }
 0x986   : > { %v1578_v49 = vadd.f32 %v1576_v46, %v2899_v56 }
 0x987   : > { %v1572_v50 = vpop.f32.mrf.mxu0 }
 0x988   : > { %v1582_v51 = vsel %vm806_vm3, %v1578_v49, -inf }
 0x989   : > { %1583 = vmax.xlane.f32.xlu1 %v1582_v51  ;;  %v2437_v52 = vpop.f32.mrf.mxu0 }
 0x99a   : > { %1651 = vrot.lane.b32.xlu1 %v2883_v47, %s2675_s27 }
 0x99e   : > { %2535 = vrot.lane.b32.xlu1 %v2534_v35, %s2676_s19 }
 0x9a2   : > { %2540 = vrot.lane.b32.xlu1 %v2539_v53, %s2677_s25 }
 0xa0a   : > { %v1581_v54 = vpop.xlane.xlu0 %1580 }
 0xa0b   : > { %v1585_v55 = vsub.f32 %v1577_v36, %v1581_v54 }
 0xa0d   : > { %v1587_v56 = vmul.f32 1.442695, %v1585_v55 }
 0xa0f   : > { %2591 = vpow2.f32 %v1587_v56 }
 0xa12   : > { %v1584_v57 = vpop.xlane.xlu1 %1583 }
 0xa13   : > { %v1586_v58 = vsub.f32 %v1578_v49, %v1584_v57 }
 0xa15   : > { %v1589_v59 = vmul.f32 1.442695, %v1586_v58 }
 0xa16   : > { %v1652_v60 = vpop.permute.xlu1 %1651 }
 0xa17   : > { %2593 = vpow2.f32 %v1589_v59  ;;  %v1657_v47 = vsel %vm935_vm5, %v1652_v60, 0 }
 0xa18   : > { %2445 = vmatpush3.bf16.msra.mxu0 %v1657_v47  ;;  %v2553_v47 = vld [vmem:[%s2815_s4 + $0x8] sm:$0xff]  }
 0xa19   : > { %2458 = vmatprep.subr.bf16.mxu0 %v2663_v20 }
 0xa1a   : > { %v2536_v21 = vpop.permute.xlu1 %2535 }
 0xa1b   : > { %v2538_v23 = vunpack.i.h.bf16 %v2536_v21  ;;  %v2537_v24 = vunpack.i.l.bf16 %v2536_v21  ;;  %v2562_v21 = vld [vmem:[%s2825_s22] sm:$0xff]  }
 0xa1c   : > { %v2592_v61 = vpop.eup %2591 }
 0xa1d   : > { %v1591_v29 = vsel %vm806_vm3, %v2592_v61, 0.0  ;;  %v1724_v28 = vsel %vm806_vm3, %v2935_v41, %v2538_v23  ;;  %v1723_v30 = vsel %vm806_vm3, %v2933_v37, %v2537_v24  ;;  %v2267_v41 = vld [vmem:[%s3163_s29] ss:$0 sm:$0xff] }
 0xa1e   : > { %1592 = vadd.xlane.f32.xlu0 %v1591_v29  ;;  %v2541_v22 = vpop.permute.xlu1 %2540 }
 0xa1f   : > { %v2543_v25 = vunpack.i.h.bf16 %v2541_v22  ;;  %v2542_v26 = vunpack.i.l.bf16 %v2541_v22  ;;  %v2273_v22 = vld [vmem:[%s656_s6] ss:$0 sm:$0xff]  ;;  %s3164_s6 = sld [smem:[#allocation6_spill]] }
 0xa21   : > { %v1726_v34 = vsel %vm1725_vm6, %v1723_v30, %v2542_v26  ;;  %v1727_v36 = vsel %vm1725_vm6, %v1724_v28, %v2543_v25 }
 0xa24   : > { %v2594_v33 = vpop.eup %2593 }
 0xa25   : > { %v1594_v35 = vsel %vm806_vm3, %v2594_v33, 0.0  ;;  %s3165_s25 = sadd.s32 4294967295, %s3164_s6  }
 0xa26   : > { %1595 = vadd.xlane.f32.xlu0 %v1594_v35  ;;  %p3102_p6 = scmp.eq.s32.totalorder %s3165_s25, 1 }
 0xa3c   : > { %1603 = vrot.lane.b32.xlu0 %v2880_v43, %s2675_s27  ;;  %s2055_s27 = sshll.u32 %s2679_s23, 4  ;;  %s2056_s27 = int_to_ptr.vmem [resolvable:$true] %s2055_s27 }
 0xa3d   : > { %s2611_s18 = scalar_lea.vmem %s2056_s27, 256  ;;  %p2618_p10 = scmp.lt.s32.totalorder %s2056_s27, %s2056_s27 }
 0xa3e   : > { %p2612_p7 = scmp.ne.s32.totalorder %s2056_s27, %s2611_s18  ;;  %p2619_p11 = scmp.lt.s32.totalorder %s2611_s18, %s2611_s18 }
 0xa40   : > { %p2613_p8 = pnand %p2612_p7, %p3102_p6  ;;  %p2620_p12 = por %p2619_p11, %p2618_p10 }
 0xa42   : > { %p2614_p9 = pneg %p2613_p8 }
 0xa44   : > { %p2621_p13 = pnand %p2620_p12, %p2614_p9 }
 0xaa7   : > { %v1593_v62 = vpop.xlane.xlu0 %1592 }
 0xaa8   : > { %2595 = vrcp.f32 %v1593_v62 }
 0xaaf   : > { %v1596_v63 = vpop.xlane.xlu0 %1595 }
 0xab0   : > { %2597 = vrcp.f32 %v1596_v63 }
 0xab3   : > { %v1604_v0 = vpop.permute.xlu0 %1603 }
 0xab4   : > { %v1609_v1 = vsel %vm935_vm5, %v1604_v0, 0 }
 0xab5   : > { %v2596_v2 = vpop.eup %2595  ;;  %2439 = vmatpush3.bf16.msra.mxu1 %v1609_v1 }
 0xab6   : > { %v1599_v3 = vmul.f32 %v2596_v2, %v2592_v61  ;;  %2450 = vmatprep.subr.bf16.mxu1 %v2663_v20  ;;  %v2554_v61 = vld [vmem:[%s2815_s4] sm:$0xff]  }
 0xab8   : > { %v1601_v4 = vpack.c.bf16 %v1599_v3, %v1599_v3  ;;  %v2271_v3 = vld [vmem:[%s645_s3] ss:$0 sm:$0xff] }
 0xaba   : > { %2441 = vmatmul.mubr.msk.bf16.vlgmr.msra.gmra.mxu1 %vm806_vm3, %v1601_v4 }
 0xabb   : > { %2454 = vmatprep.mubr.msk.bf16.mxu1 %vm2664_vm2, %v2663_v20  ;;  %2451 = vmatpush3.bf16.msra.mxu1 %v2551_v9 }
 0xabc   : > { %2452 = vmatprep.subr.bf16.mxu1 %v2663_v20 }
 0xabd   : > { %v2598_v43 = vpop.eup %2597 }
 0xabe   : > { %v1600_v7 = vmul.f32 %v2598_v43, %v2594_v33 }
 0xabf   : > { %2453 = vmatpush3.bf16.msra.mxu1 %v2552_v10 }
 0xac0   : > { %v1602_v8 = vpack.c.bf16 %v1600_v7, %v1600_v7  ;;  %2466 = vmatprep.subr.bf16.mxu1 %v2663_v20 }
 0xac2   : > { %2447 = vmatmul.mubr.msk.bf16.vlgmr.msra.gmra.mxu0 %vm806_vm3, %v1602_v8  ;;  %v2272_v8 = vld [vmem:[%s648_s28] ss:$0 sm:$0xff] }
 0xac3   : > { %2462 = vmatprep.mubr.msk.bf16.mxu0 %vm2664_vm2, %v2663_v20  ;;  %2459 = vmatpush3.bf16.msra.mxu0 %v2553_v47 }
 0xac4   : > { %2460 = vmatprep.subr.bf16.mxu0 %v2663_v20 }
 0xac7   : > { %2461 = vmatpush3.bf16.msra.mxu0 %v2554_v61 }
 0xb7a   : > { %v1645_v11 = vpop.f32.mrf.mxu1 }
 0xb7c   : > { %v2442_v12 = vpop.f32.mrf.mxu1 }
 0xb7e   : > { %v1648_v13 = vpop.f32.mrf.mxu1 }
 0xb7f   : > { %v2555_v13 = vld [vmem:[%s2825_s22 + $0x38] sm:$0xff]  }
 0xb80   : > { %v2443_v14 = vpop.f32.mrf.mxu1 }
 0xb81   : > { %v2556_v14 = vld [vmem:[%s2825_s22 + $0x30] sm:$0xff]  }
 0xb82   : > { %v1693_v15 = vpop.f32.mrf.mxu0 }
 0xb83   : > { %v2544_v16 = vpack.i.bf16 %v1693_v15, %v1645_v11  ;;  %v2557_v15 = vld [vmem:[%s2825_s22 + $0x28] sm:$0xff]  }
 0xb84   : > { %v2448_v17 = vpop.f32.mrf.mxu0 }
 0xb85   : > { %2545 = vrot.lane.b32.xlu0 %v2544_v16, %s2678_s30  ;;  %v2558_v16 = vld [vmem:[%s2825_s22 + $0x20] sm:$0xff]   ;;  %v2559_v17 = vld [vmem:[%s2825_s22 + $0x18] sm:$0xff]  }
 0xb86   : > { %v1696_v18 = vpop.f32.mrf.mxu0 }
 0xb87   : > { %v2560_v18 = vld [vmem:[%s2825_s22 + $0x10] sm:$0xff]  }
 0xb88   : > { %v2449_v19 = vpop.f32.mrf.mxu0 }
 0xb89   : > { %v2561_v19 = vld [vmem:[%s2825_s22 + $0x8] sm:$0xff]  }
 0xbf7   : > { %v2546_v27 = vpop.permute.xlu0 %2545 }
 0xbf8   : > { %v2548_v31 = vunpack.i.h.bf16 %v2546_v27  ;;  %v2547_v32 = vunpack.i.l.bf16 %v2546_v27 }
 0xbfa   : > { %v1730_v38 = vsel %vm1728_vm7, %v1727_v36, %v2548_v31  ;;  %v1729_v39 = vsel %vm1728_vm7, %v1726_v34, %v2547_v32 }
 0xbfb   : > { %v1731_v40 = vpack.c.bf16 %v1730_v38, %v1729_v39 }
 0xbfd   : > { %2455 = vmatmul.mubr.msk.bf16.vlgmr.msra.gmra.mxu1 %vm689_vm1, %v1731_v40 }
 0xbfe   : > { %2482 = vmatprep.mubr.msk.bf16.mxu1 %vm2664_vm2, %v2663_v20  ;;  %2467 = vmatpush3.bf16.msra.mxu1 %v2555_v13 }
 0xbff   : > { %2468 = vmatprep.subr.bf16.mxu1 %v2663_v20 }
 0xc02   : > { %2469 = vmatpush3.bf16.msra.mxu1 %v2556_v14 }
 0xc03   : > { %2470 = vmatprep.subr.bf16.mxu1 %v2663_v20 }
 0xc06   : > { %2471 = vmatpush3.bf16.msra.mxu1 %v2557_v15 }
 0xc07   : > { %2472 = vmatprep.subr.bf16.mxu1 %v2663_v20 }
 0xc0a   : > { %2473 = vmatpush3.bf16.msra.mxu1 %v2558_v16 }
 0xc0b   : > { %2474 = vmatprep.subr.bf16.mxu1 %v2663_v20 }
 0xc0e   : > { %2475 = vmatpush3.bf16.msra.mxu1 %v2559_v17 }
 0xc0f   : > { %2476 = vmatprep.subr.bf16.mxu1 %v2663_v20 }
 0xc12   : > { %2477 = vmatpush3.bf16.msra.mxu1 %v2560_v18 }
 0xc13   : > { %2478 = vmatprep.subr.bf16.mxu1 %v2663_v20 }
 0xc16   : > { %2479 = vmatpush3.bf16.msra.mxu1 %v2561_v19 }
 0xc17   : > { %2480 = vmatprep.subr.bf16.mxu1 %v2663_v20 }
 0xc1a   : > { %2481 = vmatpush3.bf16.msra.mxu1 %v2562_v21 }
 0xcbd   : > { %v1792_v42 = vpop.f32.mrf.mxu1 }
 0xcbe   : > { %v1793_v44 = vadd.f32 %v2267_v41, %v1792_v42 }
 0xcbf   : > { %v2456_v37 = vpop.f32.mrf.mxu1 }
 0xcc0   : > { %v3046_v45 = vadd.f32 %v1793_v44, %v2840_v5 }
 0xcc1   : > { %v1795_v46 = vpop.f32.mrf.mxu1 }
 0xcc2   : > { %v1796_v48 = vadd.f32 %v2267_v41, %v1795_v46  ;;  %v1803_v49 = vsel %vm689_vm1, %v3046_v45, 0.0  ;;  %v2279_v46 = vld [vmem:[%s664_s26] ss:$0 sm:$0xff] }
 0xcc3   : > { %1804 = vadd.xlane.f32.xlu1 %v1803_v49  ;;  %v2457_v50 = vpop.f32.mrf.mxu1 }
 0xcc4   : > { %v3051_v51 = vadd.f32 %v1796_v48, %v2842_v6 }
 0xcc6   : > { %v1806_v52 = vsel %vm689_vm1, %v3051_v51, 0.0 }
 0xcc7   : > { %1807 = vadd.xlane.f32.xlu0 %v1806_v52 }
 0xd4c   : > { %v1805_v53 = vpop.xlane.xlu1 %1804 }
 0xd4d   : > { %v1809_v54 = vmul.f32 0.03125, %v1805_v53 }
 0xd4f   : > { %v1811_v5 = vsub.f32 %v3046_v45, %v1809_v54 }
 0xd50   : > { %v1808_v55 = vpop.xlane.xlu0 %1807 }
 0xd51   : > { %v1810_v56 = vmul.f32 0.03125, %v1808_v55  ;;  %v1813_v57 = vmul.f32 %v1811_v5, %v1811_v5 }
 0xd53   : > { %v1812_v58 = vsub.f32 %v3051_v51, %v1810_v56  ;;  %v1815_v59 = vsel %vm689_vm1, %v1813_v57, 0.0 }
 0xd54   : > { %1816 = vadd.xlane.f32.xlu0 %v1815_v59 }
 0xd55   : > { %v1814_v60 = vmul.f32 %v1812_v58, %v1812_v58 }
 0xd57   : > { %v1818_v6 = vsel %vm689_vm1, %v1814_v60, 0.0 }
 0xd58   : > { %1819 = vadd.xlane.f32.xlu0 %v1818_v6 }
 0xddd   : > { %v1817_v29 = vpop.xlane.xlu0 %1816 }
 0xdde   : > { %v1821_v33 = vmul.f32 0.03125, %v1817_v29 }
 0xde0   : > { %v1823_v35 = vadd.f32 1e-05, %v1821_v33 }
 0xde1   : > { %v1820_v62 = vpop.xlane.xlu0 %1819 }
 0xde2   : > { %2599 = vrsqrt.f32 %v1823_v35  ;;  %v1822_v63 = vmul.f32 0.03125, %v1820_v62 }
 0xde4   : > { %v1824_v0 = vadd.f32 1e-05, %v1822_v63 }
 0xde6   : > { %2601 = vrsqrt.f32 %v1824_v0 }
 0xdef   : > { %v2600_v1 = vpop.eup %2599 }
 0xdf0   : > { %v1827_v2 = vmul.f32 %v2600_v1, %v1811_v5 }
 0xdf2   : > { %v1835_v7 = vmul.f32 %v2271_v3, %v1827_v2 }
 0xdf3   : > { %v2602_v4 = vpop.eup %2601 }
 0xdf4   : > { %v1828_v43 = vmul.f32 %v2602_v4, %v1812_v58  ;;  %v1843_v10 = vadd.f32 %v2272_v8, %v1835_v7 }
 0xdf6   : > { %v1836_v9 = vmul.f32 %v2271_v3, %v1828_v43 }
 0xdf8   : > { %v1844_v11 = vadd.f32 %v2272_v8, %v1836_v9 }
 0xdfa   : > { %v1845_v12 = vpack.c.bf16 %v1844_v11, %v1843_v10 }
 0xdfc   : > { %2463 = vmatmul.mubr.msk.bf16.vlgmr.msra.gmra.mxu0 %vm689_vm1, %v1845_v12 }
 0xebc   : > { %v1906_v23 = vpop.f32.mrf.mxu0 }
 0xebd   : > { %v1907_v24 = vadd.f32 %v2273_v22, %v1906_v23 }
 0xebe   : > { %v2464_v25 = vpop.f32.mrf.mxu0 }
 0xebf   : > { %v2277_v26 = vmul.f32 -1.702, %v1907_v24 }
 0xec0   : > { %v1909_v27 = vpop.f32.mrf.mxu0 }
 0xec1   : > { %v1917_v28 = vmul.f32 1.442695, %v2277_v26  ;;  %v1910_v30 = vadd.f32 %v2273_v22, %v1909_v27 }
 0xec2   : > { %v2465_v31 = vpop.f32.mrf.mxu0 }
 0xec3   : > { %2603 = vpow2.f32 %v1917_v28  ;;  %v2278_v32 = vmul.f32 -1.702, %v1910_v30 }
 0xec5   : > { %v1919_v34 = vmul.f32 1.442695, %v2278_v32 }
 0xec7   : > { %2605 = vpow2.f32 %v1919_v34 }
 0xed0   : > { %v2604_v20 = vpop.eup %2603 }
 0xed1   : > { %v1921_v36 = vadd.f32 1.0, %v2604_v20 }
 0xed3   : > { %2607 = vrcp.f32 %v1921_v36 }
 0xed4   : > { %v2606_v38 = vpop.eup %2605 }
 0xed5   : > { %v1922_v39 = vadd.f32 1.0, %v2606_v38 }
 0xed7   : > { %2609 = vrcp.f32 %v1922_v39 }
 0xee0   : > { %v2608_v40 = vpop.eup %2607 }
 0xee1   : > { %v1927_v42 = vmul.f32 %v2608_v40, %v1907_v24 }
 0xee4   : > { %v2610_v41 = vpop.eup %2609 }
 0xee5   : > { %v1928_v44 = vmul.f32 %v2610_v41, %v1910_v30 }
 0xee7   : > { %v1929_v37 = vpack.c.bf16 %v1928_v44, %v1927_v42 }
 0xee9   : > { %2483 = vmatmul.mubr.bf16.vlgmr.msra.gmra.mxu1 %v1929_v37 }
 0xfa9   : > { %v2035_v48 = vpop.f32.mrf.mxu1 }
 0xfaa   : > { %v2036_v49 = vadd.f32 %v2279_v46, %v2035_v48 }
 0xfab   : > { %v2484_v50 = vpop.f32.mrf.mxu1 }
 0xfac   : > { %v2042_v52 = vadd.f32 %v2036_v49, %v3046_v45 }
 0xfad   : > { %v2038_v53 = vpop.f32.mrf.mxu1 }
 0xfae   : > { %2044 = vst.msk [vmem:[#allocation2] sm:$0xff] %vm689_vm1, %v2042_v52  ;;  %v2039_v54 = vadd.f32 %v2279_v46, %v2038_v53 }
 0xfaf   : > { %v2485_v5 = vpop.f32.mrf.mxu1 }
 0xfb0   : > { %v2043_v55 = vadd.f32 %v2039_v54, %v3051_v51 }
 0xfb2   : > { %2045 = vst.msk [vmem:[#allocation2 + $0x8] sm:$0xff] %vm689_vm1, %v2043_v55 }
 0xfb3   : > { %2624 = shalt.err (!%p2621_p13)
}
 0xfb4   : > { %s2680_s26 = smov 128   ;;  %s3167_s14 = sld [smem:[#allocation12_spill]] }
 0xfba   : > { %2487 = dma.vmem_to_hbm [thread:$0]  (%p3102_p6), %s2056_s27, 256, %s3167_s14, [#allocation3], %s2680_s26, %s2680_s26, %s2676_s19  }
 0xfbb   : > { %2648 = dma.done.wait (%p3102_p6), [#allocation3], 256  }
 0xfbc   : > { %2650 = vsyncadd (%p3102_p6), [#allocation3], 4294967040 }
 0xfbd PF: > { %s3168_s29 = sld [smem:[#allocation6_spill]] }
 0xfbe   : > { %s3170_s30 = sld [smem:[#allocation7_spill]] }
 0xfc3   : > { %s25_s15 = sadd.s32 1, %s3168_s29   ;;  %s3169_s29 = sld [smem:[#allocation5_spill]] }
 0xfc4   : > { %p22_p0 = scmp.ge.s32.totalorder %s25_s15, 4  }
 0xfc6   :  { %24 = sbr.rel (!%p22_p0) target bundleno = 7 (0x7), region = 144 }
 0xfcb   :  { %2071 = vsyncpa [#allocation3], 1 }
 0xfcc   :  { %2073 = vsyncpa [#allocation3 + $0x1], 1 }

</bundles_post_ra>
